<compile_context>
chip_gen: v7x
topology: tpu7x:2x2x1
jax: 0.10.0
libtpu: 0.0.40
codegen_flags: <defaults>
</compile_context>

<pallas_src>
import functools
import math

import jax
import jax.numpy as jnp
from jax.experimental import pallas as pl
from jax.experimental.pallas import tpu as pltpu


def _double_conv_kernel(x_ref, mask_ref,
                        w1, b1, w2, b2, w3, b3, w4, b4,
                        o_ref, a1, a2, a3, col_buf, *, H, W, P, cpad):
    """Fused 4x (3x3 conv, pad=1, ReLU) for one batch element.

    Activation slabs are flattened as (C, (H+4)*P) bf16 with zero halo
    rows/columns; every 3x3 tap is a constant lane offset, so each conv is a
    single bf16 matmul (f32 accumulate) with contraction K = 9*cpad.
    """
    L = H * P              # length of the computed output slab (rows 2..H+1)
    Mb = (H + 4) * P       # full padded slab length
    base = 2 * P           # flat offset of padded row 2 (first output row)

    # Zero the im2col buffer once per step: the per-tap pad rows (cin..cpad)
    # are multiplied by zero weights, but must be finite -> deterministic 0.
    col_buf[...] = jnp.zeros_like(col_buf)

    # Re-zero only the top/bottom halo rows of the intermediate slabs; the
    # interior [base:base+L] is fully overwritten (halo-column-masked) every
    # step.  Scratch is per-core, so this must run every grid iteration.
    for a in (a1, a2, a3):
        a[:, 0:base] = jnp.zeros((a.shape[0], base), jnp.bfloat16)
        a[:, base + L:Mb] = jnp.zeros((a.shape[0], Mb - base - L), jnp.bfloat16)

    mask = mask_ref[...]   # (1, L) f32: 1.0 on interior columns, 0.0 on halo cols

    def conv_relu(src_ref, w_ref, b_ref, apply_mask):
        cin = src_ref.shape[0]
        # im2col: tap (dy, dx) is a constant lane shift of the zero-haloed slab.
        # Tap block t starts at sublane t*cpad (bf16 pack aligned).
        for dy in range(3):
            for dx in range(3):
                t = dy * 3 + dx
                start = (dy + 1) * P + dx - 1
                col_buf[t * cpad:t * cpad + cin, :] = (
                    src_ref[:, start:start + L].astype(jnp.bfloat16))
        out = jnp.dot(w_ref[...], col_buf[...],             # bf16 x bf16
                      preferred_element_type=jnp.float32)   # (Cout, L) f32
        out = jnp.maximum(out + b_ref[...], 0.0)            # bias + ReLU in f32
        return out * mask if apply_mask else out

    y1 = conv_relu(x_ref, w1, b1, True)                     # (C1, L)
    a1[:, base:base + L] = y1.astype(jnp.bfloat16)
    y2 = conv_relu(a1, w2, b2, True)                        # (C2, L)
    a2[:, base:base + L] = y2.astype(jnp.bfloat16)
    y3 = conv_relu(a2, w3, b3, True)                        # (C3, L)
    a3[:, base:base + L] = y3.astype(jnp.bfloat16)
    y4 = conv_relu(a3, w4, b4, False)                       # halo cols dropped later
    o_ref[...] = y4.astype(o_ref.dtype)


def _reshape_weight(w, cpad):
    """OIHW (Cout, Cin, 3, 3) -> (Cout, 9*cpad) bf16 in (dy, dx, cin) tap order,
    with the per-tap cin block zero-padded to cpad (bf16 sublane pack)."""
    cout, cin = w.shape[0], w.shape[1]
    w_t = jnp.transpose(w, (0, 2, 3, 1))                     # (Cout, 3, 3, Cin)
    w_t = jnp.pad(w_t, ((0, 0), (0, 0), (0, 0), (0, cpad - cin)))
    return w_t.reshape(cout, 9 * cpad).astype(jnp.bfloat16)


def double_conv_forward(x_nchw, params):
    """DoubleConv forward. Input/output NCHW (PyTorch convention)."""
    N, Cin, H, W = x_nchw.shape
    # Lane-dense padded row width: smallest P >= W+2 with (H*P) % 128 == 0.
    m = 128 // math.gcd(H, 128)
    P = -(-(W + 2) // m) * m
    Mb = (H + 4) * P
    L = H * P
    couts = [w.shape[0] for w, _ in params]
    cins = [Cin] + couts[:-1]
    c_last = couts[-1]
    cpad = -(-max(cins) // 16) * 16            # bf16 sublane pack per tap block

    # Zero-halo the network input once (2 extra zero rows top/bottom cover the
    # flat-index wraparound of the dx=+-1 taps; 1 left + P-1-W right columns).
    x_slab = jnp.pad(x_nchw, ((0, 0), (0, 0), (2, 2), (1, P - 1 - W))
                     ).reshape(N, Cin, Mb)

    # 1.0 on interior columns of an output-slab row, 0.0 on the halo columns.
    row_mask = jnp.zeros((P,), jnp.float32).at[1:W + 1].set(1.0)
    halo_mask = jnp.tile(row_mask, H).reshape(1, L)

    flat_params = []
    for w, b in params:
        flat_params += [_reshape_weight(w, cpad),
                        b.astype(jnp.float32).reshape(-1, 1)]

    const_spec = lambda p: pl.BlockSpec(p.shape, lambda n: (0,) * p.ndim)
    kernel = functools.partial(_double_conv_kernel, H=H, W=W, P=P, cpad=cpad)

    out_slab = pl.pallas_call(
        kernel,
        out_shape=jax.ShapeDtypeStruct((N, c_last, L), x_nchw.dtype),
        grid_spec=pltpu.PrefetchScalarGridSpec(
            num_scalar_prefetch=0,
            grid=(N,),
            in_specs=([pl.BlockSpec((None, Cin, Mb), lambda n: (n, 0, 0)),
                       const_spec(halo_mask)]
                      + [const_spec(p) for p in flat_params]),
            out_specs=pl.BlockSpec((None, c_last, L), lambda n: (n, 0, 0)),
            scratch_shapes=([pltpu.VMEM((c, Mb), jnp.bfloat16)
                             for c in couts[:-1]]                     # act1..act3
                            + [pltpu.VMEM((9 * cpad, L), jnp.bfloat16)]),  # im2col
        ),
        compiler_params=pltpu.CompilerParams(
            dimension_semantics=("parallel",)),
    )(x_slab, halo_mask, *flat_params)

    # Slab lane index = y*P + (x+1); drop the halo / pad columns per row.
    return out_slab.reshape(N, c_last, H, P)[:, :, :, 1:W + 1]


def init_params(key, in_channels, out_channels, dtype=jnp.float32):
    """Deterministic params for the 4 Conv2d layers (PyTorch OIHW layout)."""
    chans = [in_channels, out_channels, out_channels * 2,
             out_channels * 4, in_channels]
    params = []
    for i in range(4):
        cin, cout = chans[i], chans[i + 1]
        key, kw, kb = jax.random.split(key, 3)
        scale = 1.0 / jnp.sqrt(jnp.float32(cin * 9))   # ~PyTorch default init
        w = jax.random.uniform(kw, (cout, cin, 3, 3), dtype,
                               minval=-scale, maxval=scale)
        b = jax.random.uniform(kb, (cout,), dtype, minval=-scale, maxval=scale)
        params.append((w, b))
    return params


def reference_double_conv(x, params):
    """Pure-XLA reference: 4x (Conv2d k=3 p=1 + ReLU), NCHW."""
    for w, b in params:
        x = jax.lax.conv_general_dilated(
            x, w, window_strides=(1, 1), padding=((1, 1), (1, 1)),
            dimension_numbers=("NCHW", "OIHW", "NCHW"))
        x = jnp.maximum(x + b[None, :, None, None], 0.0)
    return x


if __name__ == "__main__":
    key = jax.random.PRNGKey(0)
    k_x, k_p = jax.random.split(key)

    # Small shapes: batch=2, in_channels=4, out_channels=4, spatial=16x16.
    N, Cin, Cmid, Hh, Ww = 2, 4, 4, 16, 16
    x = jax.random.normal(k_x, (N, Cin, Hh, Ww), jnp.float32)   # NCHW

    params = init_params(k_p, Cin, Cmid)

    y = jax.jit(double_conv_forward)(x, params)
    y = jax.block_until_ready(y)

    assert y.shape == (N, Cin, Hh, Ww), y.shape
    assert bool(jnp.all(y >= 0)), "ReLU output must be non-negative"

    # Sanity check vs XLA conv (bf16-class tolerance: weights/activations are
    # stored bf16 and MXU f32 at default precision also runs bf16 passes).
    y_ref = reference_double_conv(x, params)
    max_err = float(jnp.max(jnp.abs(y - y_ref)))
    assert max_err < 5e-2, f"max abs err vs reference conv = {max_err}"

    print("KERNEL_OK")
</pallas_src>

<mosaic_0001>
module attributes {stable_mosaic.version = 11 : i64} {
  func.func @_double_conv_kernel(%arg0: i32, %arg1: memref<1x4x480xf32, #tpu.memory_space<vmem>>, %arg2: memref<1x384xf32, #tpu.memory_space<vmem>>, %arg3: memref<4x144xbf16, #tpu.memory_space<vmem>>, %arg4: memref<4x1xf32, #tpu.memory_space<vmem>>, %arg5: memref<8x144xbf16, #tpu.memory_space<vmem>>, %arg6: memref<8x1xf32, #tpu.memory_space<vmem>>, %arg7: memref<16x144xbf16, #tpu.memory_space<vmem>>, %arg8: memref<16x1xf32, #tpu.memory_space<vmem>>, %arg9: memref<4x144xbf16, #tpu.memory_space<vmem>>, %arg10: memref<4x1xf32, #tpu.memory_space<vmem>>, %arg11: memref<1x4x384xf32, #tpu.memory_space<vmem>>, %arg12: memref<4x480xbf16, #tpu.memory_space<vmem>>, %arg13: memref<8x480xbf16, #tpu.memory_space<vmem>>, %arg14: memref<16x480xbf16, #tpu.memory_space<vmem>>, %arg15: memref<144x384xbf16, #tpu.memory_space<vmem>>) attributes {dimension_semantics = [#tpu.dimension_semantics<parallel>], iteration_bounds = array<i64: 2>, scalar_prefetch = 0 : i64, scratch_operands = 4 : i64, tpu.core_type = #tpu.core_type<tc>, window_params = [{transform_indices = @transform_0, window_bounds = array<i64: 1, 4, 480>}, {pipeline_mode = #tpu.pipeline_mode<synchronous>, transform_indices = @transform_1, window_bounds = array<i64: 1, 384>}, {pipeline_mode = #tpu.pipeline_mode<synchronous>, transform_indices = @transform_2, window_bounds = array<i64: 4, 144>}, {pipeline_mode = #tpu.pipeline_mode<synchronous>, transform_indices = @transform_3, window_bounds = array<i64: 4, 1>}, {pipeline_mode = #tpu.pipeline_mode<synchronous>, transform_indices = @transform_4, window_bounds = array<i64: 8, 144>}, {pipeline_mode = #tpu.pipeline_mode<synchronous>, transform_indices = @transform_5, window_bounds = array<i64: 8, 1>}, {pipeline_mode = #tpu.pipeline_mode<synchronous>, transform_indices = @transform_6, window_bounds = array<i64: 16, 144>}, {pipeline_mode = #tpu.pipeline_mode<synchronous>, transform_indices = @transform_7, window_bounds = array<i64: 16, 1>}, {pipeline_mode = #tpu.pipeline_mode<synchronous>, transform_indices = @transform_8, window_bounds = array<i64: 4, 144>}, {pipeline_mode = #tpu.pipeline_mode<synchronous>, transform_indices = @transform_9, window_bounds = array<i64: 4, 1>}, {transform_indices = @transform_10, window_bounds = array<i64: 1, 4, 384>}]} {
    %cst = arith.constant 0.000000e+00 : bf16
    %0 = vector.broadcast %cst : bf16 to vector<144x384xbf16>
    %c0 = arith.constant 0 : index
    %c0_0 = arith.constant 0 : index
    %1 = vector.load %arg15[%c0, %c0_0] : memref<144x384xbf16, #tpu.memory_space<vmem>>, vector<144x384xbf16>
    tpu.vector_store %arg15[%c0, %c0_0], %0 {strides = array<i32>} : memref<144x384xbf16, #tpu.memory_space<vmem>>, vector<144x384xbf16>,
    %cst_1 = arith.constant 0.000000e+00 : bf16
    %2 = vector.broadcast %cst_1 : bf16 to vector<4x48xbf16>
    %c0_2 = arith.constant 0 : index
    %c0_3 = arith.constant 0 : index
    %3 = vector.load %arg12[%c0_2, %c0_3] : memref<4x480xbf16, #tpu.memory_space<vmem>>, vector<4x48xbf16>
    tpu.vector_store %arg12[%c0_2, %c0_3], %2 {strides = array<i32>} : memref<4x480xbf16, #tpu.memory_space<vmem>>, vector<4x48xbf16>,
    %cst_4 = arith.constant 0.000000e+00 : bf16
    %4 = vector.broadcast %cst_4 : bf16 to vector<4x48xbf16>
    %c0_5 = arith.constant 0 : index
    %c432 = arith.constant 432 : index
    %5 = vector.load %arg12[%c0_5, %c432] : memref<4x480xbf16, #tpu.memory_space<vmem>>, vector<4x48xbf16>
    tpu.vector_store %arg12[%c0_5, %c432], %4 {strides = array<i32>} : memref<4x480xbf16, #tpu.memory_space<vmem>>, vector<4x48xbf16>,
    %cst_6 = arith.constant 0.000000e+00 : bf16
    %6 = vector.broadcast %cst_6 : bf16 to vector<8x48xbf16>
    %c0_7 = arith.constant 0 : index
    %c0_8 = arith.constant 0 : index
    %7 = vector.load %arg13[%c0_7, %c0_8] : memref<8x480xbf16, #tpu.memory_space<vmem>>, vector<8x48xbf16>
    tpu.vector_store %arg13[%c0_7, %c0_8], %6 {strides = array<i32>} : memref<8x480xbf16, #tpu.memory_space<vmem>>, vector<8x48xbf16>,
    %cst_9 = arith.constant 0.000000e+00 : bf16
    %8 = vector.broadcast %cst_9 : bf16 to vector<8x48xbf16>
    %c0_10 = arith.constant 0 : index
    %c432_11 = arith.constant 432 : index
    %9 = vector.load %arg13[%c0_10, %c432_11] : memref<8x480xbf16, #tpu.memory_space<vmem>>, vector<8x48xbf16>
    tpu.vector_store %arg13[%c0_10, %c432_11], %8 {strides = array<i32>} : memref<8x480xbf16, #tpu.memory_space<vmem>>, vector<8x48xbf16>,
    %cst_12 = arith.constant 0.000000e+00 : bf16
    %10 = vector.broadcast %cst_12 : bf16 to vector<16x48xbf16>
    %c0_13 = arith.constant 0 : index
    %c0_14 = arith.constant 0 : index
    %11 = vector.load %arg14[%c0_13, %c0_14] : memref<16x480xbf16, #tpu.memory_space<vmem>>, vector<16x48xbf16>
    tpu.vector_store %arg14[%c0_13, %c0_14], %10 {strides = array<i32>} : memref<16x480xbf16, #tpu.memory_space<vmem>>, vector<16x48xbf16>,
    %cst_15 = arith.constant 0.000000e+00 : bf16
    %12 = vector.broadcast %cst_15 : bf16 to vector<16x48xbf16>
    %c0_16 = arith.constant 0 : index
    %c432_17 = arith.constant 432 : index
    %13 = vector.load %arg14[%c0_16, %c432_17] : memref<16x480xbf16, #tpu.memory_space<vmem>>, vector<16x48xbf16>
    tpu.vector_store %arg14[%c0_16, %c432_17], %12 {strides = array<i32>} : memref<16x480xbf16, #tpu.memory_space<vmem>>, vector<16x48xbf16>,
    %c0_18 = arith.constant 0 : index
    %c0_19 = arith.constant 0 : index
    %14 = vector.load %arg2[%c0_18, %c0_19] : memref<1x384xf32, #tpu.memory_space<vmem>>, vector<1x384xf32>
    %c0_20 = arith.constant 0 : index
    %c0_21 = arith.constant 0 : index
    %c23 = arith.constant 23 : index
    %15 = vector.load %arg1[%c0_20, %c0_21, %c23] : memref<1x4x480xf32, #tpu.memory_space<vmem>>, vector<1x4x384xf32>
    %16 = vector.shape_cast %15 : vector<1x4x384xf32> to vector<4x384xf32>
    %17 = arith.truncf %16 : vector<4x384xf32> to vector<4x384xbf16>
    %c0_22 = arith.constant 0 : index
    %c0_23 = arith.constant 0 : index
    %18 = vector.load %arg15[%c0_22, %c0_23] : memref<144x384xbf16, #tpu.memory_space<vmem>>, vector<4x384xbf16>
    tpu.vector_store %arg15[%c0_22, %c0_23], %17 {strides = array<i32>} : memref<144x384xbf16, #tpu.memory_space<vmem>>, vector<4x384xbf16>,
    %c0_24 = arith.constant 0 : index
    %c0_25 = arith.constant 0 : index
    %c24 = arith.constant 24 : index
    %19 = vector.load %arg1[%c0_24, %c0_25, %c24] : memref<1x4x480xf32, #tpu.memory_space<vmem>>, vector<1x4x384xf32>
    %20 = vector.shape_cast %19 : vector<1x4x384xf32> to vector<4x384xf32>
    %21 = arith.truncf %20 : vector<4x384xf32> to vector<4x384xbf16>
    %c16 = arith.constant 16 : index
    %c0_26 = arith.constant 0 : index
    %22 = vector.load %arg15[%c16, %c0_26] : memref<144x384xbf16, #tpu.memory_space<vmem>>, vector<4x384xbf16>
    tpu.vector_store %arg15[%c16, %c0_26], %21 {strides = array<i32>} : memref<144x384xbf16, #tpu.memory_space<vmem>>, vector<4x384xbf16>,
    %c0_27 = arith.constant 0 : index
    %c0_28 = arith.constant 0 : index
    %c25 = arith.constant 25 : index
    %23 = vector.load %arg1[%c0_27, %c0_28, %c25] : memref<1x4x480xf32, #tpu.memory_space<vmem>>, vector<1x4x384xf32>
    %24 = vector.shape_cast %23 : vector<1x4x384xf32> to vector<4x384xf32>
    %25 = arith.truncf %24 : vector<4x384xf32> to vector<4x384xbf16>
    %c32 = arith.constant 32 : index
    %c0_29 = arith.constant 0 : index
    %26 = vector.load %arg15[%c32, %c0_29] : memref<144x384xbf16, #tpu.memory_space<vmem>>, vector<4x384xbf16>
    tpu.vector_store %arg15[%c32, %c0_29], %25 {strides = array<i32>} : memref<144x384xbf16, #tpu.memory_space<vmem>>, vector<4x384xbf16>,
    %c0_30 = arith.constant 0 : index
    %c0_31 = arith.constant 0 : index
    %c47 = arith.constant 47 : index
    %27 = vector.load %arg1[%c0_30, %c0_31, %c47] : memref<1x4x480xf32, #tpu.memory_space<vmem>>, vector<1x4x384xf32>
    %28 = vector.shape_cast %27 : vector<1x4x384xf32> to vector<4x384xf32>
    %29 = arith.truncf %28 : vector<4x384xf32> to vector<4x384xbf16>
    %c48 = arith.constant 48 : index
    %c0_32 = arith.constant 0 : index
    %30 = vector.load %arg15[%c48, %c0_32] : memref<144x384xbf16, #tpu.memory_space<vmem>>, vector<4x384xbf16>
    tpu.vector_store %arg15[%c48, %c0_32], %29 {strides = array<i32>} : memref<144x384xbf16, #tpu.memory_space<vmem>>, vector<4x384xbf16>,
    %c0_33 = arith.constant 0 : index
    %c0_34 = arith.constant 0 : index
    %c48_35 = arith.constant 48 : index
    %31 = vector.load %arg1[%c0_33, %c0_34, %c48_35] : memref<1x4x480xf32, #tpu.memory_space<vmem>>, vector<1x4x384xf32>
    %32 = vector.shape_cast %31 : vector<1x4x384xf32> to vector<4x384xf32>
    %33 = arith.truncf %32 : vector<4x384xf32> to vector<4x384xbf16>
    %c64 = arith.constant 64 : index
    %c0_36 = arith.constant 0 : index
    %34 = vector.load %arg15[%c64, %c0_36] : memref<144x384xbf16, #tpu.memory_space<vmem>>, vector<4x384xbf16>
    tpu.vector_store %arg15[%c64, %c0_36], %33 {strides = array<i32>} : memref<144x384xbf16, #tpu.memory_space<vmem>>, vector<4x384xbf16>,
    %c0_37 = arith.constant 0 : index
    %c0_38 = arith.constant 0 : index
    %c49 = arith.constant 49 : index
    %35 = vector.load %arg1[%c0_37, %c0_38, %c49] : memref<1x4x480xf32, #tpu.memory_space<vmem>>, vector<1x4x384xf32>
    %36 = vector.shape_cast %35 : vector<1x4x384xf32> to vector<4x384xf32>
    %37 = arith.truncf %36 : vector<4x384xf32> to vector<4x384xbf16>
    %c80 = arith.constant 80 : index
    %c0_39 = arith.constant 0 : index
    %38 = vector.load %arg15[%c80, %c0_39] : memref<144x384xbf16, #tpu.memory_space<vmem>>, vector<4x384xbf16>
    tpu.vector_store %arg15[%c80, %c0_39], %37 {strides = array<i32>} : memref<144x384xbf16, #tpu.memory_space<vmem>>, vector<4x384xbf16>,
    %c0_40 = arith.constant 0 : index
    %c0_41 = arith.constant 0 : index
    %c71 = arith.constant 71 : index
    %39 = vector.load %arg1[%c0_40, %c0_41, %c71] : memref<1x4x480xf32, #tpu.memory_space<vmem>>, vector<1x4x384xf32>
    %40 = vector.shape_cast %39 : vector<1x4x384xf32> to vector<4x384xf32>
    %41 = arith.truncf %40 : vector<4x384xf32> to vector<4x384xbf16>
    %c96 = arith.constant 96 : index
    %c0_42 = arith.constant 0 : index
    %42 = vector.load %arg15[%c96, %c0_42] : memref<144x384xbf16, #tpu.memory_space<vmem>>, vector<4x384xbf16>
    tpu.vector_store %arg15[%c96, %c0_42], %41 {strides = array<i32>} : memref<144x384xbf16, #tpu.memory_space<vmem>>, vector<4x384xbf16>,
    %c0_43 = arith.constant 0 : index
    %c0_44 = arith.constant 0 : index
    %c72 = arith.constant 72 : index
    %43 = vector.load %arg1[%c0_43, %c0_44, %c72] : memref<1x4x480xf32, #tpu.memory_space<vmem>>, vector<1x4x384xf32>
    %44 = vector.shape_cast %43 : vector<1x4x384xf32> to vector<4x384xf32>
    %45 = arith.truncf %44 : vector<4x384xf32> to vector<4x384xbf16>
    %c112 = arith.constant 112 : index
    %c0_45 = arith.constant 0 : index
    %46 = vector.load %arg15[%c112, %c0_45] : memref<144x384xbf16, #tpu.memory_space<vmem>>, vector<4x384xbf16>
    tpu.vector_store %arg15[%c112, %c0_45], %45 {strides = array<i32>} : memref<144x384xbf16, #tpu.memory_space<vmem>>, vector<4x384xbf16>,
    %c0_46 = arith.constant 0 : index
    %c0_47 = arith.constant 0 : index
    %c73 = arith.constant 73 : index
    %47 = vector.load %arg1[%c0_46, %c0_47, %c73] : memref<1x4x480xf32, #tpu.memory_space<vmem>>, vector<1x4x384xf32>
    %48 = vector.shape_cast %47 : vector<1x4x384xf32> to vector<4x384xf32>
    %49 = arith.truncf %48 : vector<4x384xf32> to vector<4x384xbf16>
    %c128 = arith.constant 128 : index
    %c0_48 = arith.constant 0 : index
    %50 = vector.load %arg15[%c128, %c0_48] : memref<144x384xbf16, #tpu.memory_space<vmem>>, vector<4x384xbf16>
    tpu.vector_store %arg15[%c128, %c0_48], %49 {strides = array<i32>} : memref<144x384xbf16, #tpu.memory_space<vmem>>, vector<4x384xbf16>,
    %c0_49 = arith.constant 0 : index
    %c0_50 = arith.constant 0 : index
    %51 = vector.load %arg3[%c0_49, %c0_50] : memref<4x144xbf16, #tpu.memory_space<vmem>>, vector<4x144xbf16>
    %c0_51 = arith.constant 0 : index
    %c0_52 = arith.constant 0 : index
    %52 = vector.load %arg15[%c0_51, %c0_52] : memref<144x384xbf16, #tpu.memory_space<vmem>>, vector<144x384xbf16>
    %cst_53 = arith.constant dense<0.000000e+00> : vector<4x384xf32>
    %53 = tpu.matmul %51, %52, %cst_53 {dimension_numbers = #tpu.dot_dimension_numbers<[1], [0], [0], [1], [0, 0, 1, 1], [], []>} : vector<4x144xbf16>, vector<144x384xbf16>, vector<4x384xf32> -> vector<4x384xf32>
    %c0_54 = arith.constant 0 : index
    %c0_55 = arith.constant 0 : index
    %54 = vector.load %arg4[%c0_54, %c0_55] : memref<4x1xf32, #tpu.memory_space<vmem>>, vector<4x1xf32>
    %55 = vector.broadcast %54 : vector<4x1xf32> to vector<4x384xf32>
    %56 = arith.addf %53, %55 : vector<4x384xf32>
    %cst_56 = arith.constant 0.000000e+00 : f32
    %57 = vector.broadcast %cst_56 : f32 to vector<4x384xf32>
    %58 = arith.maximumf %56, %57 : vector<4x384xf32>
    %59 = vector.broadcast %14 : vector<1x384xf32> to vector<4x384xf32>
    %60 = arith.mulf %58, %59 : vector<4x384xf32>
    %61 = arith.truncf %60 : vector<4x384xf32> to vector<4x384xbf16>
    %c0_57 = arith.constant 0 : index
    %c48_58 = arith.constant 48 : index
    %62 = vector.load %arg12[%c0_57, %c48_58] : memref<4x480xbf16, #tpu.memory_space<vmem>>, vector<4x384xbf16>
    tpu.vector_store %arg12[%c0_57, %c48_58], %61 {strides = array<i32>} : memref<4x480xbf16, #tpu.memory_space<vmem>>, vector<4x384xbf16>,
    %c0_59 = arith.constant 0 : index
    %c23_60 = arith.constant 23 : index
    %63 = vector.load %arg12[%c0_59, %c23_60] : memref<4x480xbf16, #tpu.memory_space<vmem>>, vector<4x384xbf16>
    %c0_61 = arith.constant 0 : index
    %c0_62 = arith.constant 0 : index
    %64 = vector.load %arg15[%c0_61, %c0_62] : memref<144x384xbf16, #tpu.memory_space<vmem>>, vector<4x384xbf16>
    tpu.vector_store %arg15[%c0_61, %c0_62], %63 {strides = array<i32>} : memref<144x384xbf16, #tpu.memory_space<vmem>>, vector<4x384xbf16>,
    %c0_63 = arith.constant 0 : index
    %c24_64 = arith.constant 24 : index
    %65 = vector.load %arg12[%c0_63, %c24_64] : memref<4x480xbf16, #tpu.memory_space<vmem>>, vector<4x384xbf16>
    %c16_65 = arith.constant 16 : index
    %c0_66 = arith.constant 0 : index
    %66 = vector.load %arg15[%c16_65, %c0_66] : memref<144x384xbf16, #tpu.memory_space<vmem>>, vector<4x384xbf16>
    tpu.vector_store %arg15[%c16_65, %c0_66], %65 {strides = array<i32>} : memref<144x384xbf16, #tpu.memory_space<vmem>>, vector<4x384xbf16>,
    %c0_67 = arith.constant 0 : index
    %c25_68 = arith.constant 25 : index
    %67 = vector.load %arg12[%c0_67, %c25_68] : memref<4x480xbf16, #tpu.memory_space<vmem>>, vector<4x384xbf16>
    %c32_69 = arith.constant 32 : index
    %c0_70 = arith.constant 0 : index
    %68 = vector.load %arg15[%c32_69, %c0_70] : memref<144x384xbf16, #tpu.memory_space<vmem>>, vector<4x384xbf16>
    tpu.vector_store %arg15[%c32_69, %c0_70], %67 {strides = array<i32>} : memref<144x384xbf16, #tpu.memory_space<vmem>>, vector<4x384xbf16>,
    %c0_71 = arith.constant 0 : index
    %c47_72 = arith.constant 47 : index
    %69 = vector.load %arg12[%c0_71, %c47_72] : memref<4x480xbf16, #tpu.memory_space<vmem>>, vector<4x384xbf16>
    %c48_73 = arith.constant 48 : index
    %c0_74 = arith.constant 0 : index
    %70 = vector.load %arg15[%c48_73, %c0_74] : memref<144x384xbf16, #tpu.memory_space<vmem>>, vector<4x384xbf16>
    tpu.vector_store %arg15[%c48_73, %c0_74], %69 {strides = array<i32>} : memref<144x384xbf16, #tpu.memory_space<vmem>>, vector<4x384xbf16>,
    %c0_75 = arith.constant 0 : index
    %c48_76 = arith.constant 48 : index
    %71 = vector.load %arg12[%c0_75, %c48_76] : memref<4x480xbf16, #tpu.memory_space<vmem>>, vector<4x384xbf16>
    %c64_77 = arith.constant 64 : index
    %c0_78 = arith.constant 0 : index
    %72 = vector.load %arg15[%c64_77, %c0_78] : memref<144x384xbf16, #tpu.memory_space<vmem>>, vector<4x384xbf16>
    tpu.vector_store %arg15[%c64_77, %c0_78], %71 {strides = array<i32>} : memref<144x384xbf16, #tpu.memory_space<vmem>>, vector<4x384xbf16>,
    %c0_79 = arith.constant 0 : index
    %c49_80 = arith.constant 49 : index
    %73 = vector.load %arg12[%c0_79, %c49_80] : memref<4x480xbf16, #tpu.memory_space<vmem>>, vector<4x384xbf16>
    %c80_81 = arith.constant 80 : index
    %c0_82 = arith.constant 0 : index
    %74 = vector.load %arg15[%c80_81, %c0_82] : memref<144x384xbf16, #tpu.memory_space<vmem>>, vector<4x384xbf16>
    tpu.vector_store %arg15[%c80_81, %c0_82], %73 {strides = array<i32>} : memref<144x384xbf16, #tpu.memory_space<vmem>>, vector<4x384xbf16>,
    %c0_83 = arith.constant 0 : index
    %c71_84 = arith.constant 71 : index
    %75 = vector.load %arg12[%c0_83, %c71_84] : memref<4x480xbf16, #tpu.memory_space<vmem>>, vector<4x384xbf16>
    %c96_85 = arith.constant 96 : index
    %c0_86 = arith.constant 0 : index
    %76 = vector.load %arg15[%c96_85, %c0_86] : memref<144x384xbf16, #tpu.memory_space<vmem>>, vector<4x384xbf16>
    tpu.vector_store %arg15[%c96_85, %c0_86], %75 {strides = array<i32>} : memref<144x384xbf16, #tpu.memory_space<vmem>>, vector<4x384xbf16>,
    %c0_87 = arith.constant 0 : index
    %c72_88 = arith.constant 72 : index
    %77 = vector.load %arg12[%c0_87, %c72_88] : memref<4x480xbf16, #tpu.memory_space<vmem>>, vector<4x384xbf16>
    %c112_89 = arith.constant 112 : index
    %c0_90 = arith.constant 0 : index
    %78 = vector.load %arg15[%c112_89, %c0_90] : memref<144x384xbf16, #tpu.memory_space<vmem>>, vector<4x384xbf16>
    tpu.vector_store %arg15[%c112_89, %c0_90], %77 {strides = array<i32>} : memref<144x384xbf16, #tpu.memory_space<vmem>>, vector<4x384xbf16>,
    %c0_91 = arith.constant 0 : index
    %c73_92 = arith.constant 73 : index
    %79 = vector.load %arg12[%c0_91, %c73_92] : memref<4x480xbf16, #tpu.memory_space<vmem>>, vector<4x384xbf16>
    %c128_93 = arith.constant 128 : index
    %c0_94 = arith.constant 0 : index
    %80 = vector.load %arg15[%c128_93, %c0_94] : memref<144x384xbf16, #tpu.memory_space<vmem>>, vector<4x384xbf16>
    tpu.vector_store %arg15[%c128_93, %c0_94], %79 {strides = array<i32>} : memref<144x384xbf16, #tpu.memory_space<vmem>>, vector<4x384xbf16>,
    %c0_95 = arith.constant 0 : index
    %c0_96 = arith.constant 0 : index
    %81 = vector.load %arg5[%c0_95, %c0_96] : memref<8x144xbf16, #tpu.memory_space<vmem>>, vector<8x144xbf16>
    %c0_97 = arith.constant 0 : index
    %c0_98 = arith.constant 0 : index
    %82 = vector.load %arg15[%c0_97, %c0_98] : memref<144x384xbf16, #tpu.memory_space<vmem>>, vector<144x384xbf16>
    %cst_99 = arith.constant dense<0.000000e+00> : vector<8x384xf32>
    %83 = tpu.matmul %81, %82, %cst_99 {dimension_numbers = #tpu.dot_dimension_numbers<[1], [0], [0], [1], [0, 0, 1, 1], [], []>} : vector<8x144xbf16>, vector<144x384xbf16>, vector<8x384xf32> -> vector<8x384xf32>
    %c0_100 = arith.constant 0 : index
    %c0_101 = arith.constant 0 : index
    %84 = vector.load %arg6[%c0_100, %c0_101] : memref<8x1xf32, #tpu.memory_space<vmem>>, vector<8x1xf32>
    %85 = vector.broadcast %84 : vector<8x1xf32> to vector<8x384xf32>
    %86 = arith.addf %83, %85 : vector<8x384xf32>
    %cst_102 = arith.constant 0.000000e+00 : f32
    %87 = vector.broadcast %cst_102 : f32 to vector<8x384xf32>
    %88 = arith.maximumf %86, %87 : vector<8x384xf32>
    %89 = vector.broadcast %14 : vector<1x384xf32> to vector<8x384xf32>
    %90 = arith.mulf %88, %89 : vector<8x384xf32>
    %91 = arith.truncf %90 : vector<8x384xf32> to vector<8x384xbf16>
    %c0_103 = arith.constant 0 : index
    %c48_104 = arith.constant 48 : index
    %92 = vector.load %arg13[%c0_103, %c48_104] : memref<8x480xbf16, #tpu.memory_space<vmem>>, vector<8x384xbf16>
    tpu.vector_store %arg13[%c0_103, %c48_104], %91 {strides = array<i32>} : memref<8x480xbf16, #tpu.memory_space<vmem>>, vector<8x384xbf16>,
    %c0_105 = arith.constant 0 : index
    %c23_106 = arith.constant 23 : index
    %93 = vector.load %arg13[%c0_105, %c23_106] : memref<8x480xbf16, #tpu.memory_space<vmem>>, vector<8x384xbf16>
    %c0_107 = arith.constant 0 : index
    %c0_108 = arith.constant 0 : index
    %94 = vector.load %arg15[%c0_107, %c0_108] : memref<144x384xbf16, #tpu.memory_space<vmem>>, vector<8x384xbf16>
    tpu.vector_store %arg15[%c0_107, %c0_108], %93 {strides = array<i32>} : memref<144x384xbf16, #tpu.memory_space<vmem>>, vector<8x384xbf16>,
    %c0_109 = arith.constant 0 : index
    %c24_110 = arith.constant 24 : index
    %95 = vector.load %arg13[%c0_109, %c24_110] : memref<8x480xbf16, #tpu.memory_space<vmem>>, vector<8x384xbf16>
    %c16_111 = arith.constant 16 : index
    %c0_112 = arith.constant 0 : index
    %96 = vector.load %arg15[%c16_111, %c0_112] : memref<144x384xbf16, #tpu.memory_space<vmem>>, vector<8x384xbf16>
    tpu.vector_store %arg15[%c16_111, %c0_112], %95 {strides = array<i32>} : memref<144x384xbf16, #tpu.memory_space<vmem>>, vector<8x384xbf16>,
    %c0_113 = arith.constant 0 : index
    %c25_114 = arith.constant 25 : index
    %97 = vector.load %arg13[%c0_113, %c25_114] : memref<8x480xbf16, #tpu.memory_space<vmem>>, vector<8x384xbf16>
    %c32_115 = arith.constant 32 : index
    %c0_116 = arith.constant 0 : index
    %98 = vector.load %arg15[%c32_115, %c0_116] : memref<144x384xbf16, #tpu.memory_space<vmem>>, vector<8x384xbf16>
    tpu.vector_store %arg15[%c32_115, %c0_116], %97 {strides = array<i32>} : memref<144x384xbf16, #tpu.memory_space<vmem>>, vector<8x384xbf16>,
    %c0_117 = arith.constant 0 : index
    %c47_118 = arith.constant 47 : index
    %99 = vector.load %arg13[%c0_117, %c47_118] : memref<8x480xbf16, #tpu.memory_space<vmem>>, vector<8x384xbf16>
    %c48_119 = arith.constant 48 : index
    %c0_120 = arith.constant 0 : index
    %100 = vector.load %arg15[%c48_119, %c0_120] : memref<144x384xbf16, #tpu.memory_space<vmem>>, vector<8x384xbf16>
    tpu.vector_store %arg15[%c48_119, %c0_120], %99 {strides = array<i32>} : memref<144x384xbf16, #tpu.memory_space<vmem>>, vector<8x384xbf16>,
    %c0_121 = arith.constant 0 : index
    %c48_122 = arith.constant 48 : index
    %101 = vector.load %arg13[%c0_121, %c48_122] : memref<8x480xbf16, #tpu.memory_space<vmem>>, vector<8x384xbf16>
    %c64_123 = arith.constant 64 : index
    %c0_124 = arith.constant 0 : index
    %102 = vector.load %arg15[%c64_123, %c0_124] : memref<144x384xbf16, #tpu.memory_space<vmem>>, vector<8x384xbf16>
    tpu.vector_store %arg15[%c64_123, %c0_124], %101 {strides = array<i32>} : memref<144x384xbf16, #tpu.memory_space<vmem>>, vector<8x384xbf16>,
    %c0_125 = arith.constant 0 : index
    %c49_126 = arith.constant 49 : index
    %103 = vector.load %arg13[%c0_125, %c49_126] : memref<8x480xbf16, #tpu.memory_space<vmem>>, vector<8x384xbf16>
    %c80_127 = arith.constant 80 : index
    %c0_128 = arith.constant 0 : index
    %104 = vector.load %arg15[%c80_127, %c0_128] : memref<144x384xbf16, #tpu.memory_space<vmem>>, vector<8x384xbf16>
    tpu.vector_store %arg15[%c80_127, %c0_128], %103 {strides = array<i32>} : memref<144x384xbf16, #tpu.memory_space<vmem>>, vector<8x384xbf16>,
    %c0_129 = arith.constant 0 : index
    %c71_130 = arith.constant 71 : index
    %105 = vector.load %arg13[%c0_129, %c71_130] : memref<8x480xbf16, #tpu.memory_space<vmem>>, vector<8x384xbf16>
    %c96_131 = arith.constant 96 : index
    %c0_132 = arith.constant 0 : index
    %106 = vector.load %arg15[%c96_131, %c0_132] : memref<144x384xbf16, #tpu.memory_space<vmem>>, vector<8x384xbf16>
    tpu.vector_store %arg15[%c96_131, %c0_132], %105 {strides = array<i32>} : memref<144x384xbf16, #tpu.memory_space<vmem>>, vector<8x384xbf16>,
    %c0_133 = arith.constant 0 : index
    %c72_134 = arith.constant 72 : index
    %107 = vector.load %arg13[%c0_133, %c72_134] : memref<8x480xbf16, #tpu.memory_space<vmem>>, vector<8x384xbf16>
    %c112_135 = arith.constant 112 : index
    %c0_136 = arith.constant 0 : index
    %108 = vector.load %arg15[%c112_135, %c0_136] : memref<144x384xbf16, #tpu.memory_space<vmem>>, vector<8x384xbf16>
    tpu.vector_store %arg15[%c112_135, %c0_136], %107 {strides = array<i32>} : memref<144x384xbf16, #tpu.memory_space<vmem>>, vector<8x384xbf16>,
    %c0_137 = arith.constant 0 : index
    %c73_138 = arith.constant 73 : index
    %109 = vector.load %arg13[%c0_137, %c73_138] : memref<8x480xbf16, #tpu.memory_space<vmem>>, vector<8x384xbf16>
    %c128_139 = arith.constant 128 : index
    %c0_140 = arith.constant 0 : index
    %110 = vector.load %arg15[%c128_139, %c0_140] : memref<144x384xbf16, #tpu.memory_space<vmem>>, vector<8x384xbf16>
    tpu.vector_store %arg15[%c128_139, %c0_140], %109 {strides = array<i32>} : memref<144x384xbf16, #tpu.memory_space<vmem>>, vector<8x384xbf16>,
    %c0_141 = arith.constant 0 : index
    %c0_142 = arith.constant 0 : index
    %111 = vector.load %arg7[%c0_141, %c0_142] : memref<16x144xbf16, #tpu.memory_space<vmem>>, vector<16x144xbf16>
    %c0_143 = arith.constant 0 : index
    %c0_144 = arith.constant 0 : index
    %112 = vector.load %arg15[%c0_143, %c0_144] : memref<144x384xbf16, #tpu.memory_space<vmem>>, vector<144x384xbf16>
    %cst_145 = arith.constant dense<0.000000e+00> : vector<16x384xf32>
    %113 = tpu.matmul %111, %112, %cst_145 {dimension_numbers = #tpu.dot_dimension_numbers<[1], [0], [0], [1], [0, 0, 1, 1], [], []>} : vector<16x144xbf16>, vector<144x384xbf16>, vector<16x384xf32> -> vector<16x384xf32>
    %c0_146 = arith.constant 0 : index
    %c0_147 = arith.constant 0 : index
    %114 = vector.load %arg8[%c0_146, %c0_147] : memref<16x1xf32, #tpu.memory_space<vmem>>, vector<16x1xf32>
    %115 = vector.broadcast %114 : vector<16x1xf32> to vector<16x384xf32>
    %116 = arith.addf %113, %115 : vector<16x384xf32>
    %cst_148 = arith.constant 0.000000e+00 : f32
    %117 = vector.broadcast %cst_148 : f32 to vector<16x384xf32>
    %118 = arith.maximumf %116, %117 : vector<16x384xf32>
    %119 = vector.broadcast %14 : vector<1x384xf32> to vector<16x384xf32>
    %120 = arith.mulf %118, %119 : vector<16x384xf32>
    %121 = arith.truncf %120 : vector<16x384xf32> to vector<16x384xbf16>
    %c0_149 = arith.constant 0 : index
    %c48_150 = arith.constant 48 : index
    %122 = vector.load %arg14[%c0_149, %c48_150] : memref<16x480xbf16, #tpu.memory_space<vmem>>, vector<16x384xbf16>
    tpu.vector_store %arg14[%c0_149, %c48_150], %121 {strides = array<i32>} : memref<16x480xbf16, #tpu.memory_space<vmem>>, vector<16x384xbf16>,
    %c0_151 = arith.constant 0 : index
    %c23_152 = arith.constant 23 : index
    %123 = vector.load %arg14[%c0_151, %c23_152] : memref<16x480xbf16, #tpu.memory_space<vmem>>, vector<16x384xbf16>
    %c0_153 = arith.constant 0 : index
    %c0_154 = arith.constant 0 : index
    %124 = vector.load %arg15[%c0_153, %c0_154] : memref<144x384xbf16, #tpu.memory_space<vmem>>, vector<16x384xbf16>
    tpu.vector_store %arg15[%c0_153, %c0_154], %123 {strides = array<i32>} : memref<144x384xbf16, #tpu.memory_space<vmem>>, vector<16x384xbf16>,
    %c0_155 = arith.constant 0 : index
    %c24_156 = arith.constant 24 : index
    %125 = vector.load %arg14[%c0_155, %c24_156] : memref<16x480xbf16, #tpu.memory_space<vmem>>, vector<16x384xbf16>
    %c16_157 = arith.constant 16 : index
    %c0_158 = arith.constant 0 : index
    %126 = vector.load %arg15[%c16_157, %c0_158] : memref<144x384xbf16, #tpu.memory_space<vmem>>, vector<16x384xbf16>
    tpu.vector_store %arg15[%c16_157, %c0_158], %125 {strides = array<i32>} : memref<144x384xbf16, #tpu.memory_space<vmem>>, vector<16x384xbf16>,
    %c0_159 = arith.constant 0 : index
    %c25_160 = arith.constant 25 : index
    %127 = vector.load %arg14[%c0_159, %c25_160] : memref<16x480xbf16, #tpu.memory_space<vmem>>, vector<16x384xbf16>
    %c32_161 = arith.constant 32 : index
    %c0_162 = arith.constant 0 : index
    %128 = vector.load %arg15[%c32_161, %c0_162] : memref<144x384xbf16, #tpu.memory_space<vmem>>, vector<16x384xbf16>
    tpu.vector_store %arg15[%c32_161, %c0_162], %127 {strides = array<i32>} : memref<144x384xbf16, #tpu.memory_space<vmem>>, vector<16x384xbf16>,
    %c0_163 = arith.constant 0 : index
    %c47_164 = arith.constant 47 : index
    %129 = vector.load %arg14[%c0_163, %c47_164] : memref<16x480xbf16, #tpu.memory_space<vmem>>, vector<16x384xbf16>
    %c48_165 = arith.constant 48 : index
    %c0_166 = arith.constant 0 : index
    %130 = vector.load %arg15[%c48_165, %c0_166] : memref<144x384xbf16, #tpu.memory_space<vmem>>, vector<16x384xbf16>
    tpu.vector_store %arg15[%c48_165, %c0_166], %129 {strides = array<i32>} : memref<144x384xbf16, #tpu.memory_space<vmem>>, vector<16x384xbf16>,
    %c0_167 = arith.constant 0 : index
    %c48_168 = arith.constant 48 : index
    %131 = vector.load %arg14[%c0_167, %c48_168] : memref<16x480xbf16, #tpu.memory_space<vmem>>, vector<16x384xbf16>
    %c64_169 = arith.constant 64 : index
    %c0_170 = arith.constant 0 : index
    %132 = vector.load %arg15[%c64_169, %c0_170] : memref<144x384xbf16, #tpu.memory_space<vmem>>, vector<16x384xbf16>
    tpu.vector_store %arg15[%c64_169, %c0_170], %131 {strides = array<i32>} : memref<144x384xbf16, #tpu.memory_space<vmem>>, vector<16x384xbf16>,
    %c0_171 = arith.constant 0 : index
    %c49_172 = arith.constant 49 : index
    %133 = vector.load %arg14[%c0_171, %c49_172] : memref<16x480xbf16, #tpu.memory_space<vmem>>, vector<16x384xbf16>
    %c80_173 = arith.constant 80 : index
    %c0_174 = arith.constant 0 : index
    %134 = vector.load %arg15[%c80_173, %c0_174] : memref<144x384xbf16, #tpu.memory_space<vmem>>, vector<16x384xbf16>
    tpu.vector_store %arg15[%c80_173, %c0_174], %133 {strides = array<i32>} : memref<144x384xbf16, #tpu.memory_space<vmem>>, vector<16x384xbf16>,
    %c0_175 = arith.constant 0 : index
    %c71_176 = arith.constant 71 : index
    %135 = vector.load %arg14[%c0_175, %c71_176] : memref<16x480xbf16, #tpu.memory_space<vmem>>, vector<16x384xbf16>
    %c96_177 = arith.constant 96 : index
    %c0_178 = arith.constant 0 : index
    %136 = vector.load %arg15[%c96_177, %c0_178] : memref<144x384xbf16, #tpu.memory_space<vmem>>, vector<16x384xbf16>
    tpu.vector_store %arg15[%c96_177, %c0_178], %135 {strides = array<i32>} : memref<144x384xbf16, #tpu.memory_space<vmem>>, vector<16x384xbf16>,
    %c0_179 = arith.constant 0 : index
    %c72_180 = arith.constant 72 : index
    %137 = vector.load %arg14[%c0_179, %c72_180] : memref<16x480xbf16, #tpu.memory_space<vmem>>, vector<16x384xbf16>
    %c112_181 = arith.constant 112 : index
    %c0_182 = arith.constant 0 : index
    %138 = vector.load %arg15[%c112_181, %c0_182] : memref<144x384xbf16, #tpu.memory_space<vmem>>, vector<16x384xbf16>
    tpu.vector_store %arg15[%c112_181, %c0_182], %137 {strides = array<i32>} : memref<144x384xbf16, #tpu.memory_space<vmem>>, vector<16x384xbf16>,
    %c0_183 = arith.constant 0 : index
    %c73_184 = arith.constant 73 : index
    %139 = vector.load %arg14[%c0_183, %c73_184] : memref<16x480xbf16, #tpu.memory_space<vmem>>, vector<16x384xbf16>
    %c128_185 = arith.constant 128 : index
    %c0_186 = arith.constant 0 : index
    %140 = vector.load %arg15[%c128_185, %c0_186] : memref<144x384xbf16, #tpu.memory_space<vmem>>, vector<16x384xbf16>
    tpu.vector_store %arg15[%c128_185, %c0_186], %139 {strides = array<i32>} : memref<144x384xbf16, #tpu.memory_space<vmem>>, vector<16x384xbf16>,
    %c0_187 = arith.constant 0 : index
    %c0_188 = arith.constant 0 : index
    %141 = vector.load %arg9[%c0_187, %c0_188] : memref<4x144xbf16, #tpu.memory_space<vmem>>, vector<4x144xbf16>
    %c0_189 = arith.constant 0 : index
    %c0_190 = arith.constant 0 : index
    %142 = vector.load %arg15[%c0_189, %c0_190] : memref<144x384xbf16, #tpu.memory_space<vmem>>, vector<144x384xbf16>
    %cst_191 = arith.constant dense<0.000000e+00> : vector<4x384xf32>
    %143 = tpu.matmul %141, %142, %cst_191 {dimension_numbers = #tpu.dot_dimension_numbers<[1], [0], [0], [1], [0, 0, 1, 1], [], []>} : vector<4x144xbf16>, vector<144x384xbf16>, vector<4x384xf32> -> vector<4x384xf32>
    %c0_192 = arith.constant 0 : index
    %c0_193 = arith.constant 0 : index
    %144 = vector.load %arg10[%c0_192, %c0_193] : memref<4x1xf32, #tpu.memory_space<vmem>>, vector<4x1xf32>
    %145 = vector.broadcast %144 : vector<4x1xf32> to vector<4x384xf32>
    %146 = arith.addf %143, %145 : vector<4x384xf32>
    %cst_194 = arith.constant 0.000000e+00 : f32
    %147 = vector.broadcast %cst_194 : f32 to vector<4x384xf32>
    %148 = arith.maximumf %146, %147 : vector<4x384xf32>
    %c0_195 = arith.constant 0 : index
    %c0_196 = arith.constant 0 : index
    %c0_197 = arith.constant 0 : index
    %149 = vector.load %arg11[%c0_195, %c0_196, %c0_197] : memref<1x4x384xf32, #tpu.memory_space<vmem>>, vector<1x4x384xf32>
    %150 = vector.shape_cast %149 : vector<1x4x384xf32> to vector<4x384xf32>
    %151 = vector.shape_cast %148 : vector<4x384xf32> to vector<1x4x384xf32>
    tpu.vector_store %arg11[%c0_195, %c0_196, %c0_197], %151 {strides = array<i32>} : memref<1x4x384xf32, #tpu.memory_space<vmem>>, vector<1x4x384xf32>,
    return
  }
  func.func @transform_0(%arg0: i32) -> (i32, i32, i32) {
    %c0_i32 = arith.constant 0 : i32
    %c0_i32_0 = arith.constant 0 : i32
    %c0_i32_1 = arith.constant 0 : i32
    return %arg0, %c0_i32, %c0_i32_0 : i32, i32, i32
  }
  func.func @transform_1(%arg0: i32) -> (i32, i32) {
    %c0_i32 = arith.constant 0 : i32
    %c0_i32_0 = arith.constant 0 : i32
    %c0_i32_1 = arith.constant 0 : i32
    return %c0_i32, %c0_i32_0 : i32, i32
  }
  func.func @transform_2(%arg0: i32) -> (i32, i32) {
    %c0_i32 = arith.constant 0 : i32
    %c0_i32_0 = arith.constant 0 : i32
    %c0_i32_1 = arith.constant 0 : i32
    return %c0_i32, %c0_i32_0 : i32, i32
  }
  func.func @transform_3(%arg0: i32) -> (i32, i32) {
    %c0_i32 = arith.constant 0 : i32
    %c0_i32_0 = arith.constant 0 : i32
    %c0_i32_1 = arith.constant 0 : i32
    return %c0_i32, %c0_i32_0 : i32, i32
  }
  func.func @transform_4(%arg0: i32) -> (i32, i32) {
    %c0_i32 = arith.constant 0 : i32
    %c0_i32_0 = arith.constant 0 : i32
    %c0_i32_1 = arith.constant 0 : i32
    return %c0_i32, %c0_i32_0 : i32, i32
  }
  func.func @transform_5(%arg0: i32) -> (i32, i32) {
    %c0_i32 = arith.constant 0 : i32
    %c0_i32_0 = arith.constant 0 : i32
    %c0_i32_1 = arith.constant 0 : i32
    return %c0_i32, %c0_i32_0 : i32, i32
  }
  func.func @transform_6(%arg0: i32) -> (i32, i32) {
    %c0_i32 = arith.constant 0 : i32
    %c0_i32_0 = arith.constant 0 : i32
    %c0_i32_1 = arith.constant 0 : i32
    return %c0_i32, %c0_i32_0 : i32, i32
  }
  func.func @transform_7(%arg0: i32) -> (i32, i32) {
    %c0_i32 = arith.constant 0 : i32
    %c0_i32_0 = arith.constant 0 : i32
    %c0_i32_1 = arith.constant 0 : i32
    return %c0_i32, %c0_i32_0 : i32, i32
  }
  func.func @transform_8(%arg0: i32) -> (i32, i32) {
    %c0_i32 = arith.constant 0 : i32
    %c0_i32_0 = arith.constant 0 : i32
    %c0_i32_1 = arith.constant 0 : i32
    return %c0_i32, %c0_i32_0 : i32, i32
  }
  func.func @transform_9(%arg0: i32) -> (i32, i32) {
    %c0_i32 = arith.constant 0 : i32
    %c0_i32_0 = arith.constant 0 : i32
    %c0_i32_1 = arith.constant 0 : i32
    return %c0_i32, %c0_i32_0 : i32, i32
  }
  func.func @transform_10(%arg0: i32) -> (i32, i32, i32) {
    %c0_i32 = arith.constant 0 : i32
    %c0_i32_0 = arith.constant 0 : i32
    %c0_i32_1 = arith.constant 0 : i32
    return %arg0, %c0_i32, %c0_i32_0 : i32, i32, i32
  }
}

</mosaic_0001>

<bundles_post_ra>
// kernel: tile.8
= control target key start
LH: loop header
LB: loop body
LE: loop exit
PB: predicated region body
PF: predicated region fallthrough
CT: control target
= control target key end

     0   :  { %s28_s0 = inlined_call_operand.vmem [shape: f32[24], index: 0, kind: input, shape index: {}]   ;;  %s29_s1 = inlined_call_operand.vmem [shape: f32[16,24], index: 1, kind: output, shape index: {}]  }
   0x1   :  { %v4_v0 = vld [vmem:[%s28_s0] ss:$0 sm:$0xff] }
   0x2   :  { %5 = vst [vmem:[%s29_s1] sm:$0xff] %v4_v0  ;;  %8 = vst [vmem:[%s29_s1 + $0x8] sm:$0xff] %v4_v0 }

// kernel: tile.9
= control target key start
LH: loop header
LB: loop body
LE: loop exit
PB: predicated region body
PF: predicated region fallthrough
CT: control target
= control target key end

     0   :  { %vm9_vm0 = vcmask 64512   ;;  %vm13_vm1 = vcmask 130048   ;;  %s171_s14 = smov 120   ;;  %s172_s15 = smov 104   ;;  %vm3_vm2 = vcmask 195584   ;;  %vm16_vm3 = vcmask 1048512   ;;  %s263_s0 = inlined_call_operand.vmem [shape: f32[16,24], index: 0, kind: input, shape index: {}]   ;;  %s264_s1 = inlined_call_operand.vmem [shape: f32[1,384], index: 1, kind: output, shape index: {}]  }
   0x1   :  { %v137_v0 = vld [vmem:[%s263_s0 + $0x5] sm:$0x1]   ;;  %v141_v3 = vld [vmem:[%s263_s0 + $0xf] sm:$0x1]   ;;  %v139_v4 = vld [vmem:[%s263_s0 + $0xa] sm:$0x1]  }
   0x2   :  { %v138_v1 = vld [vmem:[%s263_s0 + $0x5] sm:$0x1]   ;;  %34 = vrot.lane.b32.xlu1 %v141_v3, %s172_s15  ;;  %v140_v5 = vld [vmem:[%s263_s0 + $0xa] sm:$0x1]   ;;  %v142_v7 = vld [vmem:[%s263_s0 + $0x4] sm:$0x1]  }
   0x3   :  { %v10_v2 = vsel %vm9_vm0, %v138_v1, %v137_v0  ;;  %v23_v6 = vsel %vm13_vm1, %v140_v5, %v139_v4  ;;  %s173_s20 = smov 112   ;;  %s174_s21 = smov 96   ;;  %v143_v8 = vld [vmem:[%s263_s0 + $0x9] sm:$0x1]   ;;  %v144_v9 = vld [vmem:[%s263_s0 + $0xe] sm:$0x1]  }
   0x4   :  { %11 = vrot.lane.b32.xlu0 %v10_v2, %s171_s14  ;;  %v2_v10 = vld [vmem:[%s263_s0] sm:$0x1]   ;;  %s175_s28 = smov 88   ;;  %s176_s29 = smov 80   ;;  %v145_v11 = vld [vmem:[%s263_s0 + $0x3] sm:$0x1]  }
   0x5   :  { %4 = vst.msk [vmem:[#allocation0] sm:$0x1] %vm3_vm2, %v2_v10   ;;  %v146_v12 = vld [vmem:[%s263_s0 + $0x8] sm:$0x1]   ;;  %s177_s5 = smov 72   ;;  %s178_s6 = smov 64  }
   0x6   :  { %41 = vrot.lane.b32.xlu1 %v142_v7, %s174_s21  ;;  %v147_v13 = vld [vmem:[%s263_s0 + $0xd] sm:$0x1]   ;;  %v148_v14 = vld [vmem:[%s263_s0 + $0x2] sm:$0x1]   ;;  %s179_s11 = smov 56   ;;  %s180_s12 = smov 48  }
   0x7   :  { %v149_v15 = vld [vmem:[%s263_s0 + $0x7] sm:$0x1]   ;;  %v150_v16 = vld [vmem:[%s263_s0 + $0xc] sm:$0x1]   ;;  %s181_s17 = smov 40   ;;  %s182_s18 = smov 32  }
   0x8   :  { %24 = vrot.lane.b32.xlu0 %v23_v6, %s173_s20  ;;  %v151_v17 = vld [vmem:[%s263_s0 + $0x1] sm:$0x1]   ;;  %v152_v18 = vld [vmem:[%s263_s0 + $0x6] sm:$0x1]   ;;  %s183_s23 = smov 24   ;;  %s184_s24 = smov 16  }
   0x9   :  { %v153_v19 = vld [vmem:[%s263_s0 + $0xb] sm:$0x1]   ;;  %s185_s0 = smov 8   ;;  %vm29_vm4 = vcmask 1048448   ;;  %vm43_vm5 = vcmask 982784   ;;  %vm36_vm6 = vcmask 1048384  }
   0xa   :  { %54 = vrot.lane.b32.xlu1 %v144_v9, %s176_s29  ;;  %vm49_vm7 = vcmask 917184   ;;  %vm56_vm8 = vcmask 851584   ;;  %vm63_vm9 = vcmask 785984   ;;  %vm69_vm10 = vcmask 720384  }
   0xb   :  { %vm76_vm11 = vcmask 654784   ;;  %vm83_vm12 = vcmask 589184   ;;  %vm89_vm13 = vcmask 523584   ;;  %vm96_vm14 = vcmask 457984  }
   0xc   :  { %47 = vrot.lane.b32.xlu0 %v143_v8, %s175_s28  ;;  %vm103_vm15 = vcmask 392384  }
   0xe   :  { %67 = vrot.lane.b32.xlu1 %v146_v12, %s178_s6 }
  0x10   :  { %61 = vrot.lane.b32.xlu0 %v145_v11, %s177_s5 }
  0x12   :  { %81 = vrot.lane.b32.xlu1 %v148_v14, %s180_s12 }
  0x14   :  { %74 = vrot.lane.b32.xlu0 %v147_v13, %s179_s11 }
  0x16   :  { %94 = vrot.lane.b32.xlu1 %v150_v16, %s182_s18 }
  0x18   :  { %87 = vrot.lane.b32.xlu0 %v149_v15, %s181_s17 }
  0x1a   :  { %107 = vrot.lane.b32.xlu1 %v152_v18, %s184_s24 }
  0x1c   :  { %101 = vrot.lane.b32.xlu0 %v151_v17, %s183_s23 }
  0x20   :  { %114 = vrot.lane.b32.xlu0 %v153_v19, %s185_s0 }
  0x74   :  { %v35_v21 = vpop.permute.xlu1 %34  }
  0x76   :  { %v12_v20 = vpop.permute.xlu0 %11  }
  0x77   :  { %15 = vst.msk [vmem:[#allocation0 + $0x8] sm:$0x1] %vm13_vm1, %v12_v20   ;;  %vm116_vm1 = vcmask 261184  }
  0x78   :  { %17 = vst.msk [vmem:[#allocation0] sm:$0x1] %vm16_vm3, %v12_v20   ;;  %v42_v23 = vpop.permute.xlu1 %41  }
  0x79   :  { %44 = vst.msk [vmem:[#allocation0] sm:$0x1] %vm43_vm5, %v42_v23  }
  0x7a   :  { %v25_v22 = vpop.permute.xlu0 %24  }
  0x7b   :  { %28 = vst.msk [vmem:[#allocation0 + $0x10] sm:$0x1] %vm9_vm0, %v25_v22   ;;  %vm109_vm0 = vcmask 326784  }
  0x7c   :  { %31 = vst.msk [vmem:[#allocation0 + $0x8] sm:$0x1] %vm29_vm4, %v25_v22   ;;  %v55_v25 = vpop.permute.xlu1 %54  }
  0x7d   :  { %38 = vst.msk [vmem:[#allocation0 + $0x10] sm:$0x1] %vm36_vm6, %v35_v21  }
  0x7e   :  { %v48_v24 = vpop.permute.xlu0 %47   ;;  %58 = vst.msk [vmem:[#allocation0 + $0x10] sm:$0x1] %vm56_vm8, %v55_v25  }
  0x7f   :  { %51 = vst.msk [vmem:[#allocation0 + $0x8] sm:$0x1] %vm49_vm7, %v48_v24  }
  0x80   :  { %v68_v27 = vpop.permute.xlu1 %67  }
  0x81   :  { %71 = vst.msk [vmem:[#allocation0 + $0x8] sm:$0x1] %vm69_vm10, %v68_v27  }
  0x82   :  { %v62_v26 = vpop.permute.xlu0 %61  }
  0x83   :  { %64 = vst.msk [vmem:[#allocation0] sm:$0x1] %vm63_vm9, %v62_v26  }
  0x84   :  { %v82_v29 = vpop.permute.xlu1 %81  }
  0x85   :  { %84 = vst.msk [vmem:[#allocation0] sm:$0x1] %vm83_vm12, %v82_v29  }
  0x86   :  { %v75_v28 = vpop.permute.xlu0 %74  }
  0x87   :  { %78 = vst.msk [vmem:[#allocation0 + $0x10] sm:$0x1] %vm76_vm11, %v75_v28  }
  0x88   :  { %v95_v31 = vpop.permute.xlu1 %94  }
  0x89   :  { %98 = vst.msk [vmem:[#allocation0 + $0x10] sm:$0x1] %vm96_vm14, %v95_v31  }
  0x8a   :  { %v88_v30 = vpop.permute.xlu0 %87  }
  0x8b   :  { %91 = vst.msk [vmem:[#allocation0 + $0x8] sm:$0x1] %vm89_vm13, %v88_v30  }
  0x8c   :  { %v108_v33 = vpop.permute.xlu1 %107  }
  0x8d   :  { %111 = vst.msk [vmem:[#allocation0 + $0x8] sm:$0x1] %vm109_vm0, %v108_v33  }
  0x8e   :  { %v102_v32 = vpop.permute.xlu0 %101  }
  0x8f   :  { %104 = vst.msk [vmem:[#allocation0] sm:$0x1] %vm103_vm15, %v102_v32  }
  0x92   :  { %v115_v34 = vpop.permute.xlu0 %114  }
  0x93   :  { %118 = vst.msk [vmem:[#allocation0 + $0x10] sm:$0x1] %vm116_vm1, %v115_v34  }
  0x94   :  { %v126_v36 = vld [vmem:[#allocation0 + $0x8] sm:$0x1] }
  0x95   :  { %154 = vst [vmem:[%s264_s1 + $0x1] sm:$0x1] %v126_v36 }
  0x96   :  { %v122_v35 = vld [vmem:[#allocation0] sm:$0x1] }
  0x97   :  { %124 = vst [vmem:[%s264_s1] sm:$0x1] %v122_v35 }
  0x9a   :  { %v131_v37 = vld [vmem:[#allocation0 + $0x10] sm:$0x1] }
  0x9b   :  { %155 = vst [vmem:[%s264_s1 + $0x2] sm:$0x1] %v131_v37 }

// kernel: double_conv_forward.1
= control target key start
LH: loop header
LB: loop body
LE: loop exit
PB: predicated region body
PF: predicated region fallthrough
CT: control target
= control target key end

     0   :  { %s2405_s13 = smov 0   ;;  %s2893_s0 = inlined_call_operand.vmem [shape: f32[2,4,480], index: 0, kind: input, shape index: {}]   ;;  %s2894_s1 = inlined_call_operand.vmem [shape: f32[1,384], index: 1, kind: input, shape index: {}]   ;;  %s2895_s2 = inlined_call_operand.vmem [shape: bf16[4,144], index: 2, kind: input, shape index: {}]   ;;  %s2896_s3 = inlined_call_operand.vmem [shape: f32[4,1], index: 3, kind: input, shape index: {}]   ;;  %s2897_s4 = inlined_call_operand.vmem [shape: bf16[8,144], index: 4, kind: input, shape index: {}]   ;;  %s2898_s5 = inlined_call_operand.vmem [shape: f32[8,1], index: 5, kind: input, shape index: {}]   ;;  %s2899_s6 = inlined_call_operand.vmem [shape: bf16[16,144], index: 6, kind: input, shape index: {}]   ;;  %s2900_s7 = inlined_call_operand.vmem [shape: f32[16,1], index: 7, kind: input, shape index: {}]   ;;  %s2901_s8 = inlined_call_operand.vmem [shape: bf16[4,144], index: 8, kind: input, shape index: {}]   ;;  %s2902_s9 = inlined_call_operand.vmem [shape: f32[4,1], index: 9, kind: input, shape index: {}]   ;;  %s2903_s10 = inlined_call_operand.vmem [shape: f32[2,4,384], index: 10, kind: output, shape index: {}]  }
   0x1 LB: > { %s2229_s14 = sadd.s32 4294967295, %s2336_s13   ;;  %p2233_p0 = scmp.ge.s32.totalorder %s2336_s13, 1  ;;  %s2336_s13 = sphi %s2405_s13, %s20_s13  }
   0x2   : > { %p312_p1 = scmp.lt.s32.totalorder %s2336_s13, 3 }
   0x4   : > { %p313_p2 = pnand %p2233_p0, %p312_p1 }
   0x5   : > { %p2415_p3 = scmp.lt.s32.totalorder (!%p313_p2), %s2229_s14, 1  ;;  %v2338_v0 = vmov (!%p313_p2), 0   ;;  %s2339_s20 = smov (!%p313_p2), 105   ;;  %vm751_vm0 = vcmask (!%p313_p2), 130048   ;;  %v735_v11 = vld [vmem:[%s2896_s3] sm:$0xf] (!%p313_p2) }
   0x6   : > { %316 = sbr.rel (%p313_p2) target bundleno = 2059 (0x80b), region = 60  ;;  %361 = vst [vmem:[#allocation5] sm:$0xff] (!%p313_p2), %v2338_v0  ;;  %362 = vst [vmem:[#allocation5 + $0x8] sm:$0xff] (!%p313_p2), %v2338_v0  ;;  %796 = vmatprep.subr.bf16.mxu1 (!%p313_p2), %v2338_v0  ;;  %2316 = vset.pattern.permute.xlu0 (!%p313_p2), %v2338_v0  ;;  %s2340_s21 = smov (!%p313_p2), 104   ;;  %vm425_vm1 = vcmask (!%p313_p2), 859136   ;;  %vm459_vm2 = vcmask (!%p313_p2), 850944  }
   0x7   : > { %363 = vst [vmem:[#allocation5 + $0x10] sm:$0xff] (!%p313_p2), %v2338_v0  ;;  %364 = vst [vmem:[#allocation5 + $0x18] sm:$0xff] (!%p313_p2), %v2338_v0  ;;  %2317 = vset.pattern.permute.xlu1 (!%p313_p2), %v2338_v0  ;;  %s2341_s22 = smov (!%p313_p2), 103   ;;  %s2342_s23 = smov (!%p313_p2), 81   ;;  %vm493_vm3 = vcmask (!%p313_p2), 842752   ;;  %vm527_vm4 = vcmask (!%p313_p2), 662528  }
   0x8   : > { %365 = vst [vmem:[#allocation5 + $0x20] sm:$0xff] (!%p313_p2), %v2338_v0  ;;  %366 = vst [vmem:[#allocation5 + $0x28] sm:$0xff] (!%p313_p2), %v2338_v0  ;;  %s2343_s24 = smov (!%p313_p2), 80   ;;  %s2344_s25 = smov (!%p313_p2), 79   ;;  %vm561_vm5 = vcmask (!%p313_p2), 654336   ;;  %vm595_vm6 = vcmask (!%p313_p2), 646144  }
   0x9   : > { %367 = vst [vmem:[#allocation5 + $0x30] sm:$0xff] (!%p313_p2), %v2338_v0  ;;  %368 = vst [vmem:[#allocation5 + $0x38] sm:$0xff] (!%p313_p2), %v2338_v0  ;;  %s2345_s26 = smov (!%p313_p2), 57   ;;  %s2346_s27 = smov (!%p313_p2), 56   ;;  %vm629_vm7 = vcmask (!%p313_p2), 465920   ;;  %vm2905_vm8 = vcmask (!%p313_p2), 457728  }
   0xa   : > { %369 = vst [vmem:[#allocation5 + $0x40] sm:$0xff] (!%p313_p2), %v2338_v0  ;;  %370 = vst [vmem:[#allocation5 + $0x48] sm:$0xff] (!%p313_p2), %v2338_v0  ;;  %v2494_v9 = vld.sshfl [vmem:[%s2895_s2] sm:$0x33 pattern:$0x76325410] (!%p313_p2) }
   0xb   : > { %371 = vst [vmem:[#allocation5 + $0x50] sm:$0xff] (!%p313_p2), %v2338_v0  ;;  %372 = vst [vmem:[#allocation5 + $0x58] sm:$0xff] (!%p313_p2), %v2338_v0  ;;  %s2347_s30 = smov (!%p313_p2), 55   ;;  %v749_v10 = vcombine.high (!%p313_p2), %v2494_v9, %v2494_v9  ;;  %vm2904_vm9 = vcmask (!%p313_p2), 449536   ;;  %vm388_vm10 = vcmask (!%p313_p2), 386048   ;;  %vm390_vm11 = vcmask (!%p313_p2), 779648  }
   0xc   : > { %373 = vst [vmem:[#allocation5 + $0x60] sm:$0xff] (!%p313_p2), %v2338_v0  ;;  %374 = vst [vmem:[#allocation5 + $0x68] sm:$0xff] (!%p313_p2), %v2338_v0  ;;  %vm396_vm12 = vcmask (!%p313_p2), 392192   ;;  %s2349_s17 = smov (!%p313_p2), 48   ;;  %vm886_vm13 = vcmask (!%p313_p2), 1041792   ;;  %vm887_vm14 = vcmask (!%p313_p2), 1043458  }
   0xd   : > { %375 = vst [vmem:[#allocation5 + $0x70] sm:$0xff] %v2338_v0  ;;  %376 = vst [vmem:[#allocation5 + $0x78] sm:$0xff] %v2338_v0  ;;  %s2926_s14 = smov (!%p2415_p3, %s2229_s14), 1  ;;  %2238 = vmatprep.mubr.msk.bf16.mxu0 %vm751_vm0, %v749_v10  ;;  %2239 = vmatprep.mubr.msk.bf16.mxu1 %vm751_vm0, %v749_v10 }
   0xe   : > { %377 = vst [vmem:[#allocation5 + $0x80] sm:$0xff] %v2338_v0  ;;  %378 = vst [vmem:[#allocation5 + $0x88] sm:$0xff] %v2338_v0  ;;  %s2292_s16 = sshll.u32 %s2926_s14, 4 }
   0xf   : > { %379 = vst [vmem:[#allocation5 + $0x90] sm:$0xff] %v2338_v0  ;;  %380 = vst [vmem:[#allocation5 + $0x98] sm:$0xff] %v2338_v0  ;;  %s354_s19 = scalar_lea.vmem %s2893_s0, %s2292_s16 }
  0x10   : > { %381 = vst [vmem:[#allocation5 + $0xa0] sm:$0xff] %v2338_v0  ;;  %382 = vst [vmem:[#allocation5 + $0xa8] sm:$0xff] %v2338_v0  ;;  %v402_v1 = vld [vmem:[%s354_s19 + $0x8] sm:$0xff]  ;;  %v401_v2 = vld [vmem:[%s354_s19] sm:$0xff] }
  0x11   : > { %383 = vst [vmem:[#allocation5 + $0xb0] sm:$0xff] %v2338_v0  ;;  %384 = vst [vmem:[#allocation5 + $0xb8] sm:$0xff] %v2338_v0  ;;  %v411_v3 = vpack.c.bf16 %v402_v1, %v402_v1  ;;  %v409_v4 = vpack.c.bf16 %v401_v2, %v401_v2  ;;  %v405_v5 = vcombine.high %v401_v2, %v401_v2 }
  0x12   : > { %385 = vst [vmem:[#allocation5 + $0xc0] sm:$0xff] %v2338_v0  ;;  %386 = vst [vmem:[#allocation5 + $0xc8] sm:$0xff] %v2338_v0  ;;  %v406_v6 = vcombine.high %v402_v1, %v402_v1 }
  0x13   : > { %387 = vst [vmem:[#allocation5 + $0xd0] sm:$0xff] %v2338_v0  ;;  %421 = vrot.lane.b32.xlu0 %v411_v3, %s2339_s20  ;;  %417 = vrot.lane.b32.xlu1 %v409_v4, %s2339_s20  ;;  %v410_v7 = vpack.c.bf16 %v405_v5, %v405_v5  ;;  %389 = vst.msk [vmem:[#allocation2] sm:$0x3] %vm388_vm10, %v2338_v0  ;;  %vm889_vm10 = vcmask 1045508  }
  0x14   : > { %v412_v8 = vpack.c.bf16 %v406_v6, %v406_v6  ;;  %391 = vst.msk [vmem:[#allocation2 + $0x6] sm:$0x3] %vm390_vm11, %v2338_v0  ;;  %vm888_vm15 = vmor %vm887_vm14, %vm886_vm13  ;;  %vm2909_vm13 = vcmask 449536  }
  0x15   : > { %397 = vst.msk [vmem:[#allocation4] sm:$0xff] %vm396_vm12, %v2338_v0  ;;  %vm890_vm11 = vmor %vm889_vm10, %vm888_vm15 }
  0x16   : > { %vm2911_vm15 = vmmov %vm2909_vm13 }
  0x17   : > { %455 = vrot.lane.b32.xlu1 %v411_v3, %s2340_s21  ;;  %419 = vrot.lane.b32.xlu0 %v410_v7, %s2339_s20  ;;  %vm2912_vm10 = vmmov %vm2909_vm13 }
  0x1b   : > { %423 = vrot.lane.b32.xlu1 %v412_v8, %s2339_s20  ;;  %453 = vrot.lane.b32.xlu0 %v410_v7, %s2340_s21 }
  0x1f   : > { %457 = vrot.lane.b32.xlu1 %v412_v8, %s2340_s21  ;;  %451 = vrot.lane.b32.xlu0 %v409_v4, %s2340_s21 }
  0x23   : > { %489 = vrot.lane.b32.xlu1 %v411_v3, %s2341_s22  ;;  %487 = vrot.lane.b32.xlu0 %v410_v7, %s2341_s22 }
  0x27   : > { %491 = vrot.lane.b32.xlu1 %v412_v8, %s2341_s22  ;;  %485 = vrot.lane.b32.xlu0 %v409_v4, %s2341_s22 }
  0x2b   : > { %523 = vrot.lane.b32.xlu1 %v411_v3, %s2342_s23  ;;  %521 = vrot.lane.b32.xlu0 %v410_v7, %s2342_s23 }
  0x2f   : > { %525 = vrot.lane.b32.xlu1 %v412_v8, %s2342_s23  ;;  %519 = vrot.lane.b32.xlu0 %v409_v4, %s2342_s23 }
  0x33   : > { %557 = vrot.lane.b32.xlu1 %v411_v3, %s2343_s24  ;;  %555 = vrot.lane.b32.xlu0 %v410_v7, %s2343_s24 }
  0x37   : > { %559 = vrot.lane.b32.xlu1 %v412_v8, %s2343_s24  ;;  %553 = vrot.lane.b32.xlu0 %v409_v4, %s2343_s24 }
  0x3b   : > { %591 = vrot.lane.b32.xlu1 %v411_v3, %s2344_s25  ;;  %589 = vrot.lane.b32.xlu0 %v410_v7, %s2344_s25 }
  0x3f   : > { %593 = vrot.lane.b32.xlu1 %v412_v8, %s2344_s25  ;;  %587 = vrot.lane.b32.xlu0 %v409_v4, %s2344_s25 }
  0x43   : > { %625 = vrot.lane.b32.xlu1 %v411_v3, %s2345_s26  ;;  %623 = vrot.lane.b32.xlu0 %v410_v7, %s2345_s26 }
  0x47   : > { %627 = vrot.lane.b32.xlu1 %v412_v8, %s2345_s26  ;;  %621 = vrot.lane.b32.xlu0 %v409_v4, %s2345_s26 }
  0x4b   : > { %659 = vrot.lane.b32.xlu1 %v411_v3, %s2346_s27  ;;  %657 = vrot.lane.b32.xlu0 %v410_v7, %s2346_s27 }
  0x4f   : > { %661 = vrot.lane.b32.xlu1 %v412_v8, %s2346_s27  ;;  %655 = vrot.lane.b32.xlu0 %v409_v4, %s2346_s27 }
  0x53   : > { %693 = vrot.lane.b32.xlu1 %v411_v3, %s2347_s30  ;;  %691 = vrot.lane.b32.xlu0 %v410_v7, %s2347_s30 }
  0x57   : > { %695 = vrot.lane.b32.xlu1 %v412_v8, %s2347_s30  ;;  %689 = vrot.lane.b32.xlu0 %v409_v4, %s2347_s30 }
  0x5b   : > { %738 = vperm.xlu0 %2316, %v735_v11  }
  0x85   : > { %v422_v12 = vpop.permute.xlu0 %421  ;;  %v418_v13 = vpop.permute.xlu1 %417 }
  0x89   : > { %v456_v14 = vpop.permute.xlu1 %455  ;;  %v420_v15 = vpop.permute.xlu0 %419 }
  0x8a   : > { %v426_v16 = vsel %vm425_vm1, %v418_v13, %v420_v15  ;;  %v427_v17 = vsel %vm425_vm1, %v420_v15, %v422_v12 }
  0x8b   : > { %432 = vst [vmem:[#allocation5] sm:$0x3] %v426_v16  ;;  %433 = vst [vmem:[#allocation5 + $0x8] sm:$0x3] %v427_v17 }
  0x8d   : > { %v424_v18 = vpop.permute.xlu1 %423  ;;  %v454_v19 = vpop.permute.xlu0 %453 }
  0x8e   : > { %v428_v20 = vsel %vm425_vm1, %v422_v12, %v424_v18  ;;  %v461_v21 = vsel %vm459_vm2, %v454_v19, %v456_v14 }
  0x8f   : > { %434 = vst [vmem:[#allocation5 + $0x10] sm:$0x3] %v428_v20  ;;  %467 = vst [vmem:[#allocation5 + $0x20] sm:$0x3] %v461_v21 }
  0x91   : > { %v458_v22 = vpop.permute.xlu1 %457  ;;  %v452_v23 = vpop.permute.xlu0 %451 }
  0x92   : > { %v462_v24 = vsel %vm459_vm2, %v456_v14, %v458_v22  ;;  %v460_v25 = vsel %vm459_vm2, %v452_v23, %v454_v19  ;;  %v709_v26 = vld [vmem:[#allocation5 + $0x8] sm:$0xff]  ;;  %v708_v27 = vld [vmem:[#allocation5] sm:$0xff] }
  0x93   : > { %468 = vst [vmem:[#allocation5 + $0x28] sm:$0x3] %v462_v24  ;;  %466 = vst [vmem:[#allocation5 + $0x18] sm:$0x3] %v460_v25  ;;  %755 = vmatprep.subr.bf16.mxu0 %v709_v26 }
  0x94   : > { %756 = vmatpush1.bf16.msra.mxu0 %v708_v27 }
  0x95   : > { %v490_v28 = vpop.permute.xlu1 %489  ;;  %v488_v29 = vpop.permute.xlu0 %487 }
  0x96   : > { %v495_v30 = vsel %vm493_vm3, %v488_v29, %v490_v28  ;;  %v712_v31 = vld [vmem:[#allocation5 + $0x20] sm:$0xff]  ;;  %v710_v32 = vld [vmem:[#allocation5 + $0x10] sm:$0xff] }
  0x97   : > { %501 = vst [vmem:[#allocation5 + $0x38] sm:$0x3] %v495_v30  ;;  %757 = vmatprep.subr.bf16.mxu0 %v712_v31  ;;  %797 = vmatpush1.bf16.msra.mxu1 %v710_v32 }
  0x98   : > { %798 = vmatprep.subr.bf16.mxu1 %v2338_v0 }
  0x99   : > { %v492_v33 = vpop.permute.xlu1 %491  ;;  %v486_v34 = vpop.permute.xlu0 %485 }
  0x9a   : > { %v496_v35 = vsel %vm493_vm3, %v490_v28, %v492_v33  ;;  %v494_v36 = vsel %vm493_vm3, %v486_v34, %v488_v29  ;;  %v711_v37 = vld [vmem:[#allocation5 + $0x18] sm:$0xff]  ;;  %v713_v38 = vld [vmem:[#allocation5 + $0x28] sm:$0xff] }
  0x9b   : > { %502 = vst [vmem:[#allocation5 + $0x40] sm:$0x3] %v496_v35  ;;  %500 = vst [vmem:[#allocation5 + $0x30] sm:$0x3] %v494_v36  ;;  %758 = vmatpush1.bf16.msra.mxu0 %v711_v37  ;;  %799 = vmatpush1.bf16.msra.mxu1 %v713_v38 }
  0x9c   : > { %800 = vmatprep.subr.bf16.mxu1 %v2338_v0 }
  0x9d   : > { %v524_v39 = vpop.permute.xlu1 %523  ;;  %v522_v40 = vpop.permute.xlu0 %521 }
  0x9e   : > { %v529_v41 = vsel %vm527_vm4, %v522_v40, %v524_v39  ;;  %v715_v42 = vld [vmem:[#allocation5 + $0x38] sm:$0xff] }
  0x9f   : > { %535 = vst [vmem:[#allocation5 + $0x50] sm:$0x3] %v529_v41  ;;  %759 = vmatprep.subr.bf16.mxu0 %v715_v42 }
  0xa1   : > { %v526_v43 = vpop.permute.xlu1 %525  ;;  %v520_v44 = vpop.permute.xlu0 %519 }
  0xa2   : > { %v530_v45 = vsel %vm527_vm4, %v524_v39, %v526_v43  ;;  %v528_v46 = vsel %vm527_vm4, %v520_v44, %v522_v40  ;;  %v714_v47 = vld [vmem:[#allocation5 + $0x30] sm:$0xff]  ;;  %v716_v48 = vld [vmem:[#allocation5 + $0x40] sm:$0xff]  ;;  %v840_v40 = vlaneseq  ;;  %v400_v43 = vld [vmem:[%s2894_s1] sm:$0x7]  ;;  %v2348_v44 = vmov 1983009808  }
  0xa3   : > { %536 = vst [vmem:[#allocation5 + $0x58] sm:$0x3] %v530_v45  ;;  %534 = vst [vmem:[#allocation5 + $0x48] sm:$0x3] %v528_v46  ;;  %760 = vmatpush1.bf16.msra.mxu0 %v714_v47  ;;  %801 = vmatpush1.bf16.msra.mxu1 %v716_v48  ;;  %v866_v45 = vunpack.c.l.s4 %v2348_v44 }
  0xa4   : > { %802 = vmatprep.subr.bf16.mxu1 %v2338_v0  ;;  %v841_v41 = vshrl.u32 %v840_v40, 7 }
  0xa5   : > { %v558_v49 = vpop.permute.xlu1 %557  ;;  %v556_v50 = vpop.permute.xlu0 %555 }
  0xa6   : > { %v563_v51 = vsel %vm561_vm5, %v556_v50, %v558_v49  ;;  %v718_v52 = vld [vmem:[#allocation5 + $0x50] sm:$0xff]  ;;  %v850_v42 = vsub.s32 2, %v841_v41  ;;  %v846_v47 = vsub.s32 1, %v841_v41 }
  0xa7   : > { %569 = vst [vmem:[#allocation5 + $0x68] sm:$0x3] %v563_v51  ;;  %761 = vmatprep.subr.bf16.mxu0 %v718_v52  ;;  %v867_v51 = vunpack.c.0.s8 %v866_v45 }
  0xa9   : > { %v560_v53 = vpop.permute.xlu1 %559  ;;  %v554_v54 = vpop.permute.xlu0 %553 }
  0xaa   : > { %v564_v55 = vsel %vm561_vm5, %v558_v49, %v560_v53  ;;  %v562_v56 = vsel %vm561_vm5, %v554_v54, %v556_v50  ;;  %v717_v57 = vld [vmem:[#allocation5 + $0x48] sm:$0xff]  ;;  %v719_v58 = vld [vmem:[#allocation5 + $0x58] sm:$0xff]  ;;  %v2552_v50 = vrot.slane %v400_v43, %v850_v42 }
  0xab   : > { %570 = vst [vmem:[#allocation5 + $0x70] sm:$0x3] %v564_v55  ;;  %568 = vst [vmem:[#allocation5 + $0x60] sm:$0x3] %v562_v56  ;;  %762 = vmatpush1.bf16.msra.mxu0 %v717_v57  ;;  %803 = vmatpush1.bf16.msra.mxu1 %v719_v58  ;;  %v2556_v58 = vrot.slane %v400_v43, %v846_v47 }
  0xac   : > { %804 = vmatprep.subr.bf16.mxu1 %v2338_v0 }
  0xad   : > { %v592_v59 = vpop.permute.xlu1 %591  ;;  %v590_v60 = vpop.permute.xlu0 %589 }
  0xae   : > { %v597_v61 = vsel %vm595_vm6, %v590_v60, %v592_v59  ;;  %v721_v62 = vld [vmem:[#allocation5 + $0x68] sm:$0xff] }
  0xaf   : > { %603 = vst [vmem:[#allocation5 + $0x80] sm:$0x3] %v597_v61  ;;  %763 = vmatprep.subr.bf16.mxu0 %v721_v62 }
  0xb1   : > { %v594_v63 = vpop.permute.xlu1 %593  ;;  %v588_v1 = vpop.permute.xlu0 %587 }
  0xb2   : > { %v598_v2 = vsel %vm595_vm6, %v592_v59, %v594_v63  ;;  %v596_v3 = vsel %vm595_vm6, %v588_v1, %v590_v60  ;;  %v720_v4 = vld [vmem:[#allocation5 + $0x60] sm:$0xff]  ;;  %v722_v5 = vld [vmem:[#allocation5 + $0x70] sm:$0xff] }
  0xb3   : > { %604 = vst [vmem:[#allocation5 + $0x88] sm:$0x3] %v598_v2  ;;  %602 = vst [vmem:[#allocation5 + $0x78] sm:$0x3] %v596_v3  ;;  %764 = vmatpush1.bf16.msra.mxu0 %v720_v4  ;;  %805 = vmatpush1.bf16.msra.mxu1 %v722_v5  ;;  %v870_v3 = vsub.s32 %v867_v51, %v841_v41 }
  0xb4   : > { %806 = vmatprep.subr.bf16.mxu1 %v2338_v0 }
  0xb5   : > { %v626_v6 = vpop.permute.xlu1 %625  ;;  %v624_v7 = vpop.permute.xlu0 %623 }
  0xb6   : > { %v631_v8 = vsel %vm629_vm7, %v624_v7, %v626_v6  ;;  %v724_v10 = vld [vmem:[#allocation5 + $0x80] sm:$0xff] }
  0xb7   : > { %637 = vst [vmem:[#allocation5 + $0x98] sm:$0x3] %v631_v8  ;;  %765 = vmatprep.subr.bf16.mxu0 %v724_v10 }
  0xb9   : > { %v628_v11 = vpop.permute.xlu1 %627  ;;  %v622_v12 = vpop.permute.xlu0 %621 }
  0xba   : > { %v632_v13 = vsel %vm629_vm7, %v626_v6, %v628_v11  ;;  %v630_v14 = vsel %vm629_vm7, %v622_v12, %v624_v7  ;;  %v723_v15 = vld [vmem:[#allocation5 + $0x78] sm:$0xff]  ;;  %v725_v16 = vld [vmem:[#allocation5 + $0x88] sm:$0xff] }
  0xbb   : > { %638 = vst [vmem:[#allocation5 + $0xa0] sm:$0x3] %v632_v13  ;;  %636 = vst [vmem:[#allocation5 + $0x90] sm:$0x3] %v630_v14  ;;  %766 = vmatpush1.bf16.msra.mxu0 %v723_v15  ;;  %807 = vmatpush1.bf16.msra.mxu1 %v725_v16 }
  0xbc   : > { %808 = vmatprep.subr.bf16.mxu1 %v2338_v0 }
  0xbd   : > { %v660_v17 = vpop.permute.xlu1 %659  ;;  %v658_v18 = vpop.permute.xlu0 %657 }
  0xbe   : > { %v665_v19 = vsel %vm2905_vm8, %v658_v18, %v660_v17  ;;  %v727_v20 = vld [vmem:[#allocation5 + $0x98] sm:$0xff] }
  0xbf   : > { %671 = vst [vmem:[#allocation5 + $0xb0] sm:$0x3] %v665_v19  ;;  %767 = vmatprep.subr.bf16.mxu0 %v727_v20 }
  0xc1   : > { %v662_v21 = vpop.permute.xlu1 %661  ;;  %v656_v22 = vpop.permute.xlu0 %655 }
  0xc2   : > { %v666_v23 = vsel %vm2905_vm8, %v660_v17, %v662_v21  ;;  %v664_v24 = vsel %vm2905_vm8, %v656_v22, %v658_v18  ;;  %v726_v25 = vld [vmem:[#allocation5 + $0x90] sm:$0xff]  ;;  %v728_v26 = vld [vmem:[#allocation5 + $0xa0] sm:$0xff]  ;;  %v2598_v22 = vld [vmem:[%s2897_s4] sm:$0xff] }
  0xc3   : > { %672 = vst [vmem:[#allocation5 + $0xb8] sm:$0x3] %v666_v23  ;;  %670 = vst [vmem:[#allocation5 + $0xa8] sm:$0x3] %v664_v24  ;;  %768 = vmatpush1.bf16.msra.mxu0 %v726_v25  ;;  %809 = vmatpush1.bf16.msra.mxu1 %v728_v26  ;;  %v2242_v23 = vcombine.high %v2598_v22, %v2598_v22  ;;  %v1246_v24 = vld [vmem:[%s2898_s5] sm:$0xff] }
  0xc4   : > { %810 = vmatprep.subr.bf16.mxu1 %v2338_v0 }
  0xc5   : > { %v694_v27 = vpop.permute.xlu1 %693  ;;  %v692_v28 = vpop.permute.xlu0 %691 }
  0xc6   : > { %v699_v29 = vsel %vm2904_vm9, %v692_v28, %v694_v27  ;;  %v730_v30 = vld [vmem:[#allocation5 + $0xb0] sm:$0xff] }
  0xc7   : > { %705 = vst [vmem:[#allocation5 + $0xc8] sm:$0x3] %v699_v29  ;;  %769 = vmatprep.subr.bf16.mxu0 %v730_v30 }
  0xc9   : > { %v696_v31 = vpop.permute.xlu1 %695  ;;  %v690_v32 = vpop.permute.xlu0 %689 }
  0xca   : > { %v700_v33 = vsel %vm2904_vm9, %v694_v27, %v696_v31  ;;  %v698_v34 = vsel %vm2904_vm9, %v690_v32, %v692_v28  ;;  %v729_v35 = vld [vmem:[#allocation5 + $0xa8] sm:$0xff]  ;;  %v731_v36 = vld [vmem:[#allocation5 + $0xb8] sm:$0xff]  ;;  %vm891_vm9 = vcmask 392198  }
  0xcb   : > { %706 = vst [vmem:[#allocation5 + $0xd0] sm:$0x3] %v700_v33  ;;  %704 = vst [vmem:[#allocation5 + $0xc0] sm:$0x3] %v698_v34  ;;  %770 = vmatpush1.bf16.msra.mxu0 %v729_v35  ;;  %811 = vmatpush1.bf16.msra.mxu1 %v731_v36 }
  0xcc   : > { %812 = vmatprep.subr.bf16.mxu1 %v2338_v0  ;;  %vm892_vm8 = vmor %vm891_vm9, %vm890_vm11  ;;  %vm392_vm11 = vcmask 388096  }
  0xcd   : > { %393 = vst.msk [vmem:[#allocation3] sm:$0xf] %vm392_vm11, %v2338_v0 }
  0xce   : > { %v733_v37 = vld [vmem:[#allocation5 + $0xc8] sm:$0xff] }
  0xcf   : > { %771 = vmatprep.subr.bf16.mxu0 %v733_v37 }
  0xd2   : > { %v732_v38 = vld [vmem:[#allocation5 + $0xc0] sm:$0xff]  ;;  %v734_v39 = vld [vmem:[#allocation5 + $0xd0] sm:$0xff] }
  0xd3   : > { %772 = vmatpush1.bf16.msra.mxu0 %v732_v38  ;;  %813 = vmatpush1.bf16.msra.mxu1 %v734_v39 }
  0xd4   : > { %1302 = vmatprep.subr.bf16.mxu1 %v2338_v0 }
  0xd6   : > { %788 = vmatmul.mubr.bf16.vlgmr.msra.gmra.mrb[0].mxu0 %v2494_v9  ;;  %829 = vmatmul.mubr.bf16.vlgmr.msra.gmra.mrb[0].mxu1 %v2494_v9  ;;  %v842_v9 = vsub.s32 0, %v841_v41 }
  0xd7   : > { %2243 = vmatprep.mubr.msk.bf16.mxu0 %vm751_vm0, %v2242_v23  ;;  %2244 = vmatprep.mubr.msk.bf16.mxu1 %vm751_vm0, %v2242_v23 }
  0xd8   : > { %v2554_v55 = vrot.slane %v400_v43, %v842_v9 }
  0xda   : > { %v739_v46 = vpop.permute.xlu0 %738 }
 0x1a9   : > { %v789_v48 = vpop.f32.mrb[0].mxu0  ;;  %v830_v49 = vpop.f32.mrb[0].mxu1 }
 0x1aa   : > { %v790_v52 = vadd.f32 %v789_v48, %v739_v46  ;;  %v831_v53 = vadd.f32 %v830_v49, %v739_v46  ;;  %v791_v54 = vpop.f32.mrb[1].mxu0  ;;  %v832_v56 = vpop.f32.mrb[1].mxu1 }
 0x1ab   : > { %v792_v57 = vadd.f32 %v791_v54, %v739_v46  ;;  %v793_v59 = vpop.f32.mrb[2].mxu0  ;;  %v833_v60 = vpop.f32.mrb[2].mxu1 }
 0x1ac   : > { %v836_v61 = vmax.f32 %v790_v52, 0.0  ;;  %v838_v62 = vmax.f32 %v831_v53, 0.0  ;;  %v794_v63 = vpop.f32.mrb[3].mxu0  ;;  %v834_v1 = vpop.f32.mrb[3].mxu1 }
 0x1ad   : > { %v837_v2 = vmax.f32 %v792_v57, 0.0 }
 0x1ae   : > { %v857_v4 = vmul.f32 %v2552_v50, %v838_v62  ;;  %v855_v5 = vmul.f32 %v2554_v55, %v836_v61 }
 0x1af   : > { %v856_v6 = vmul.f32 %v2556_v58, %v837_v2 }
 0x1b0   : > { %v860_v7 = vpack.c.bf16 %v857_v4, %v857_v4 }
 0x1b1   : > { %v2240_v8 = vpack.c.bf16 %v856_v6, %v855_v5 }
 0x1b2   : > { %v878_v10 = vrot.slane %v860_v7, %v870_v3 }
 0x1b3   : > { %v871_v11 = vrot.slane %v2240_v8, %v870_v3 }
 0x1b5   : > { %v879_v12 = vcombine.low %v871_v11, %v878_v10 }
 0x1b7   : > { %880 = vrot.lane.b32.xlu1 %v879_v12, %s2349_s17 }
 0x229   : > { %v881_v13 = vpop.permute.xlu1 %880 }
 0x22a   : > { %v882_v14 = vrot.slane %v881_v13, 6 }
 0x22c   : > { %v884_v15 = vsel %vm396_vm12, %v882_v14, %v881_v13 }
 0x22d   : > { %893 = vst.msk [vmem:[#allocation2] sm:$0xff] %vm892_vm8, %v884_v15  ;;  %vm2907_vm8 = vcmask 457728  }
 0x22e   : > { %vm2908_vm9 = vmmov %vm2907_vm8 }
 0x22f   : > { %vm2910_vm14 = vmmov %vm2907_vm8 }
 0x234   : > { %v894_v16 = vld [vmem:[#allocation2] sm:$0xff] }
 0x235   : > { %v903_v17 = vrot.slane %v894_v16, %v870_v3  ;;  %v896_v18 = vcombine.high %v894_v16, %v894_v16 }
 0x237   : > { %913 = vrot.lane.b32.xlu1 %v903_v17, %s2339_s20  ;;  %v910_v19 = vrot.slane %v896_v18, %v870_v3  ;;  %v911_v20 = vcombine.high %v903_v17, %v903_v17 }
 0x239   : > { %917 = vrot.lane.b32.xlu0 %v910_v19, %s2339_s20  ;;  %v912_v21 = vcombine.high %v910_v19, %v910_v19 }
 0x23b   : > { %949 = vrot.lane.b32.xlu1 %v903_v17, %s2340_s21 }
 0x23d   : > { %953 = vrot.lane.b32.xlu0 %v910_v19, %s2340_s21 }
 0x23f   : > { %985 = vrot.lane.b32.xlu1 %v903_v17, %s2341_s22 }
 0x241   : > { %989 = vrot.lane.b32.xlu0 %v910_v19, %s2341_s22 }
 0x243   : > { %1021 = vrot.lane.b32.xlu1 %v903_v17, %s2342_s23 }
 0x245   : > { %1025 = vrot.lane.b32.xlu0 %v910_v19, %s2342_s23 }
 0x247   : > { %1057 = vrot.lane.b32.xlu1 %v903_v17, %s2343_s24 }
 0x249   : > { %1061 = vrot.lane.b32.xlu0 %v910_v19, %s2343_s24 }
 0x24b   : > { %1093 = vrot.lane.b32.xlu1 %v903_v17, %s2344_s25 }
 0x24d   : > { %1097 = vrot.lane.b32.xlu0 %v910_v19, %s2344_s25 }
 0x24f   : > { %1129 = vrot.lane.b32.xlu1 %v903_v17, %s2345_s26 }
 0x251   : > { %1133 = vrot.lane.b32.xlu0 %v910_v19, %s2345_s26 }
 0x253   : > { %1165 = vrot.lane.b32.xlu1 %v903_v17, %s2346_s27 }
 0x255   : > { %1169 = vrot.lane.b32.xlu0 %v910_v19, %s2346_s27 }
 0x257   : > { %915 = vrot.lane.b32.xlu1 %v911_v20, %s2339_s20 }
 0x259   : > { %1205 = vrot.lane.b32.xlu0 %v910_v19, %s2347_s30 }
 0x25b   : > { %951 = vrot.lane.b32.xlu1 %v911_v20, %s2340_s21 }
 0x25d   : > { %919 = vrot.lane.b32.xlu0 %v912_v21, %s2339_s20 }
 0x25f   : > { %987 = vrot.lane.b32.xlu1 %v911_v20, %s2341_s22 }
 0x261   : > { %955 = vrot.lane.b32.xlu0 %v912_v21, %s2340_s21 }
 0x263   : > { %1023 = vrot.lane.b32.xlu1 %v911_v20, %s2342_s23 }
 0x265   : > { %991 = vrot.lane.b32.xlu0 %v912_v21, %s2341_s22 }
 0x267   : > { %1059 = vrot.lane.b32.xlu1 %v911_v20, %s2343_s24 }
 0x269   : > { %1027 = vrot.lane.b32.xlu0 %v912_v21, %s2342_s23 }
 0x26b   : > { %1095 = vrot.lane.b32.xlu1 %v911_v20, %s2344_s25 }
 0x26d   : > { %1063 = vrot.lane.b32.xlu0 %v912_v21, %s2343_s24 }
 0x26f   : > { %1131 = vrot.lane.b32.xlu1 %v911_v20, %s2345_s26 }
 0x271   : > { %1099 = vrot.lane.b32.xlu0 %v912_v21, %s2344_s25 }
 0x273   : > { %1167 = vrot.lane.b32.xlu1 %v911_v20, %s2346_s27 }
 0x275   : > { %1135 = vrot.lane.b32.xlu0 %v912_v21, %s2345_s26 }
 0x277   : > { %1203 = vrot.lane.b32.xlu1 %v911_v20, %s2347_s30 }
 0x279   : > { %1171 = vrot.lane.b32.xlu0 %v912_v21, %s2346_s27 }
 0x27b   : > { %1201 = vrot.lane.b32.xlu1 %v903_v17, %s2347_s30 }
 0x27d   : > { %1207 = vrot.lane.b32.xlu0 %v912_v21, %s2347_s30 }
 0x27f   : > { %1249 = vperm.xlu1 %2317, %v1246_v24  }
 0x2a9   : > { %v914_v25 = vpop.permute.xlu1 %913 }
 0x2ab   : > { %v918_v26 = vpop.permute.xlu0 %917 }
 0x2ad   : > { %v950_v27 = vpop.permute.xlu1 %949 }
 0x2af   : > { %v954_v28 = vpop.permute.xlu0 %953 }
 0x2b1   : > { %v986_v29 = vpop.permute.xlu1 %985 }
 0x2b3   : > { %v990_v30 = vpop.permute.xlu0 %989 }
 0x2b5   : > { %v1022_v31 = vpop.permute.xlu1 %1021 }
 0x2b7   : > { %v1026_v32 = vpop.permute.xlu0 %1025 }
 0x2b9   : > { %v1058_v33 = vpop.permute.xlu1 %1057 }
 0x2bb   : > { %v2611_v34 = vpop.permute.xlu0 %1061 }
 0x2bd   : > { %v2613_v35 = vpop.permute.xlu1 %1093 }
 0x2bf   : > { %v2615_v36 = vpop.permute.xlu0 %1097 }
 0x2c1   : > { %v2617_v37 = vpop.permute.xlu1 %1129 }
 0x2c3   : > { %v2619_v38 = vpop.permute.xlu0 %1133 }
 0x2c5   : > { %v2621_v39 = vpop.permute.xlu1 %1165 }
 0x2c7   : > { %v2623_v40 = vpop.permute.xlu0 %1169 }
 0x2c9   : > { %v916_v41 = vpop.permute.xlu1 %915 }
 0x2ca   : > { %v921_v42 = vsel %vm425_vm1, %v914_v25, %v916_v41  ;;  %v922_v43 = vsel %vm425_vm1, %v916_v41, %v918_v26 }
 0x2cb   : > { %927 = vst [vmem:[#allocation5] sm:$0x3] %v921_v42  ;;  %928 = vst [vmem:[#allocation5 + $0x8] sm:$0x3] %v922_v43  ;;  %v2627_v44 = vpop.permute.xlu0 %1205 }
 0x2cd   : > { %v952_v45 = vpop.permute.xlu1 %951 }
 0x2ce   : > { %v957_v9 = vsel %vm459_vm2, %v950_v27, %v952_v45  ;;  %v958_v46 = vsel %vm459_vm2, %v952_v45, %v954_v28 }
 0x2cf   : > { %963 = vst [vmem:[#allocation5 + $0x18] sm:$0x3] %v957_v9  ;;  %964 = vst [vmem:[#allocation5 + $0x20] sm:$0x3] %v958_v46  ;;  %v920_v47 = vpop.permute.xlu0 %919 }
 0x2d0   : > { %v923_v48 = vsel %vm425_vm1, %v918_v26, %v920_v47 }
 0x2d1   : > { %929 = vst [vmem:[#allocation5 + $0x10] sm:$0x3] %v923_v48  ;;  %v988_v49 = vpop.permute.xlu1 %987 }
 0x2d2   : > { %v993_v51 = vsel %vm493_vm3, %v986_v29, %v988_v49  ;;  %v994_v52 = vsel %vm493_vm3, %v988_v49, %v990_v30  ;;  %v1220_v53 = vld [vmem:[#allocation5 + $0x8] sm:$0xff]  ;;  %v1219_v54 = vld [vmem:[#allocation5] sm:$0xff] }
 0x2d3   : > { %999 = vst [vmem:[#allocation5 + $0x30] sm:$0x3] %v993_v51  ;;  %1000 = vst [vmem:[#allocation5 + $0x38] sm:$0x3] %v994_v52  ;;  %1261 = vmatprep.subr.bf16.mxu0 %v1220_v53  ;;  %v956_v56 = vpop.permute.xlu0 %955 }
 0x2d4   : > { %v959_v57 = vsel %vm459_vm2, %v954_v28, %v956_v56  ;;  %1262 = vmatpush1.bf16.msra.mxu0 %v1219_v54 }
 0x2d5   : > { %965 = vst [vmem:[#allocation5 + $0x28] sm:$0x3] %v959_v57  ;;  %v1024_v59 = vpop.permute.xlu1 %1023  ;;  %v2241_v57 = vcombine.low %v2598_v22, %v2598_v22 }
 0x2d6   : > { %v1029_v60 = vsel %vm527_vm4, %v1022_v31, %v1024_v59  ;;  %v1030_v61 = vsel %vm527_vm4, %v1024_v59, %v1026_v32  ;;  %v1223_v62 = vld [vmem:[#allocation5 + $0x20] sm:$0xff]  ;;  %v1222_v63 = vld [vmem:[#allocation5 + $0x18] sm:$0xff] }
 0x2d7   : > { %1035 = vst [vmem:[#allocation5 + $0x48] sm:$0x3] %v1029_v60  ;;  %1036 = vst [vmem:[#allocation5 + $0x50] sm:$0x3] %v1030_v61  ;;  %1263 = vmatprep.subr.bf16.mxu0 %v1223_v62  ;;  %v992_v1 = vpop.permute.xlu0 %991 }
 0x2d8   : > { %v995_v2 = vsel %vm493_vm3, %v990_v30, %v992_v1  ;;  %1264 = vmatpush1.bf16.msra.mxu0 %v1222_v63  ;;  %v1221_v3 = vld [vmem:[#allocation5 + $0x10] sm:$0xff] }
 0x2d9   : > { %1001 = vst [vmem:[#allocation5 + $0x40] sm:$0x3] %v995_v2  ;;  %v1060_v4 = vpop.permute.xlu1 %1059  ;;  %1303 = vmatpush1.bf16.msra.mxu1 %v1221_v3 }
 0x2da   : > { %v1065_v5 = vsel %vm561_vm5, %v1058_v33, %v1060_v4  ;;  %v1066_v6 = vsel %vm561_vm5, %v1060_v4, %v2611_v34  ;;  %v1226_v7 = vld [vmem:[#allocation5 + $0x38] sm:$0xff]  ;;  %v1225_v8 = vld [vmem:[#allocation5 + $0x30] sm:$0xff]  ;;  %1304 = vmatprep.subr.bf16.mxu1 %v2338_v0 }
 0x2db   : > { %1071 = vst [vmem:[#allocation5 + $0x60] sm:$0x3] %v1065_v5  ;;  %1072 = vst [vmem:[#allocation5 + $0x68] sm:$0x3] %v1066_v6  ;;  %1265 = vmatprep.subr.bf16.mxu0 %v1226_v7  ;;  %v1028_v10 = vpop.permute.xlu0 %1027 }
 0x2dc   : > { %v1031_v11 = vsel %vm527_vm4, %v1026_v32, %v1028_v10  ;;  %1266 = vmatpush1.bf16.msra.mxu0 %v1225_v8  ;;  %v1224_v12 = vld [vmem:[#allocation5 + $0x28] sm:$0xff] }
 0x2dd   : > { %1037 = vst [vmem:[#allocation5 + $0x58] sm:$0x3] %v1031_v11  ;;  %v1096_v13 = vpop.permute.xlu1 %1095  ;;  %1305 = vmatpush1.bf16.msra.mxu1 %v1224_v12 }
 0x2de   : > { %v1101_v14 = vsel %vm595_vm6, %v2613_v35, %v1096_v13  ;;  %v1102_v15 = vsel %vm595_vm6, %v1096_v13, %v2615_v36  ;;  %v1229_v16 = vld [vmem:[#allocation5 + $0x50] sm:$0xff]  ;;  %v1228_v17 = vld [vmem:[#allocation5 + $0x48] sm:$0xff]  ;;  %1306 = vmatprep.subr.bf16.mxu1 %v2338_v0 }
 0x2df   : > { %1107 = vst [vmem:[#allocation5 + $0x78] sm:$0x3] %v1101_v14  ;;  %1108 = vst [vmem:[#allocation5 + $0x80] sm:$0x3] %v1102_v15  ;;  %1267 = vmatprep.subr.bf16.mxu0 %v1229_v16  ;;  %v1064_v18 = vpop.permute.xlu0 %1063 }
 0x2e0   : > { %v1067_v19 = vsel %vm561_vm5, %v2611_v34, %v1064_v18  ;;  %1268 = vmatpush1.bf16.msra.mxu0 %v1228_v17  ;;  %v1227_v20 = vld [vmem:[#allocation5 + $0x40] sm:$0xff] }
 0x2e1   : > { %1073 = vst [vmem:[#allocation5 + $0x70] sm:$0x3] %v1067_v19  ;;  %v1132_v21 = vpop.permute.xlu1 %1131  ;;  %1307 = vmatpush1.bf16.msra.mxu1 %v1227_v20 }
 0x2e2   : > { %v1137_v23 = vsel %vm629_vm7, %v2617_v37, %v1132_v21  ;;  %v1138_v24 = vsel %vm629_vm7, %v1132_v21, %v2619_v38  ;;  %v1232_v25 = vld [vmem:[#allocation5 + $0x68] sm:$0xff]  ;;  %v1231_v26 = vld [vmem:[#allocation5 + $0x60] sm:$0xff]  ;;  %1308 = vmatprep.subr.bf16.mxu1 %v2338_v0 }
 0x2e3   : > { %1143 = vst [vmem:[#allocation5 + $0x90] sm:$0x3] %v1137_v23  ;;  %1144 = vst [vmem:[#allocation5 + $0x98] sm:$0x3] %v1138_v24  ;;  %1269 = vmatprep.subr.bf16.mxu0 %v1232_v25  ;;  %v1100_v27 = vpop.permute.xlu0 %1099 }
 0x2e4   : > { %v1103_v28 = vsel %vm595_vm6, %v2615_v36, %v1100_v27  ;;  %1270 = vmatpush1.bf16.msra.mxu0 %v1231_v26  ;;  %v1230_v29 = vld [vmem:[#allocation5 + $0x58] sm:$0xff] }
 0x2e5   : > { %1109 = vst [vmem:[#allocation5 + $0x88] sm:$0x3] %v1103_v28  ;;  %v1168_v30 = vpop.permute.xlu1 %1167  ;;  %1309 = vmatpush1.bf16.msra.mxu1 %v1230_v29 }
 0x2e6   : > { %v1173_v31 = vsel %vm2907_vm8, %v2621_v39, %v1168_v30  ;;  %v1174_v32 = vsel %vm2908_vm9, %v1168_v30, %v2623_v40  ;;  %v1235_v33 = vld [vmem:[#allocation5 + $0x80] sm:$0xff]  ;;  %v1234_v34 = vld [vmem:[#allocation5 + $0x78] sm:$0xff]  ;;  %1310 = vmatprep.subr.bf16.mxu1 %v2338_v0  ;;  %vm394_vm8 = vcmask 781696   ;;  %vm1371_vm9 = vcmask 1043840   ;;  %v2327_v30 = vld [vmem:[%s2899_s6 + $0x4] ss:$8 sps:$4 sm:$0xff]  }
 0x2e7   : > { %1179 = vst [vmem:[#allocation5 + $0xa8] sm:$0x3] %v1173_v31  ;;  %1180 = vst [vmem:[#allocation5 + $0xb0] sm:$0x3] %v1174_v32  ;;  %1271 = vmatprep.subr.bf16.mxu0 %v1235_v33  ;;  %v1136_v35 = vpop.permute.xlu0 %1135  ;;  %v1669_v31 = vld [vmem:[%s2900_s7] sm:$0xff]  ;;  %v1670_v32 = vld [vmem:[%s2900_s7 + $0x8] sm:$0xff] }
 0x2e8   : > { %v1139_v36 = vsel %vm629_vm7, %v2619_v38, %v1136_v35  ;;  %1272 = vmatpush1.bf16.msra.mxu0 %v1234_v34  ;;  %v1233_v37 = vld [vmem:[#allocation5 + $0x70] sm:$0xff]  ;;  %395 = vst.msk [vmem:[#allocation3 + $0xc] sm:$0xf] %vm394_vm8, %v2338_v0  ;;  %vm2913_vm8 = vcmask 457728  }
 0x2e9   : > { %1145 = vst [vmem:[#allocation5 + $0xa0] sm:$0x3] %v1139_v36  ;;  %v1204_v41 = vpop.permute.xlu1 %1203  ;;  %1311 = vmatpush1.bf16.msra.mxu1 %v1233_v37 }
 0x2ea   : > { %v1210_v39 = vsel %vm2909_vm13, %v1204_v41, %v2627_v44  ;;  %v1238_v42 = vld [vmem:[#allocation5 + $0x98] sm:$0xff]  ;;  %v1237_v43 = vld [vmem:[#allocation5 + $0x90] sm:$0xff]  ;;  %1312 = vmatprep.subr.bf16.mxu1 %v2338_v0  ;;  %vm1372_vm13 = vcmask 1047556  }
 0x2eb   : > { %1216 = vst [vmem:[#allocation5 + $0xc8] sm:$0x3] %v1210_v39  ;;  %1273 = vmatprep.subr.bf16.mxu0 %v1238_v42  ;;  %v1172_v45 = vpop.permute.xlu0 %1171 }
 0x2ec   : > { %v1175_v9 = vsel %vm2910_vm14, %v2623_v40, %v1172_v45  ;;  %1274 = vmatpush1.bf16.msra.mxu0 %v1237_v43  ;;  %v1236_v38 = vld [vmem:[#allocation5 + $0x88] sm:$0xff]  ;;  %vm1366_vm14 = vcmask 1043456  }
 0x2ed   : > { %1181 = vst [vmem:[#allocation5 + $0xb8] sm:$0x3] %v1175_v9  ;;  %v1202_v46 = vpop.permute.xlu1 %1201  ;;  %1313 = vmatpush1.bf16.msra.mxu1 %v1236_v38 }
 0x2ee   : > { %v1209_v47 = vsel %vm2911_vm15, %v1202_v46, %v1204_v41  ;;  %v1241_v48 = vld [vmem:[#allocation5 + $0xb0] sm:$0xff]  ;;  %v1240_v49 = vld [vmem:[#allocation5 + $0xa8] sm:$0xff]  ;;  %1314 = vmatprep.subr.bf16.mxu1 %v2338_v0  ;;  %vm1376_vm15 = vcmask 392196  }
 0x2ef   : > { %1215 = vst [vmem:[#allocation5 + $0xc0] sm:$0x3] %v1209_v47  ;;  %1275 = vmatprep.subr.bf16.mxu0 %v1241_v48  ;;  %v1208_v51 = vpop.permute.xlu0 %1207  ;;  %vm1377_vm11 = vmor %vm1376_vm15, %vm1366_vm14 }
 0x2f0   : > { %v1211_v52 = vsel %vm2912_vm10, %v2627_v44, %v1208_v51  ;;  %1276 = vmatpush1.bf16.msra.mxu0 %v1240_v49  ;;  %v1239_v53 = vld [vmem:[#allocation5 + $0xa0] sm:$0xff]  ;;  %vm1373_vm10 = vmor %vm1372_vm13, %vm1371_vm9 }
 0x2f1   : > { %1217 = vst [vmem:[#allocation5 + $0xd0] sm:$0x3] %v1211_v52  ;;  %1315 = vmatpush1.bf16.msra.mxu1 %v1239_v53  ;;  %vm2914_vm9 = vmmov %vm2913_vm8 }
 0x2f2   : > { %v1244_v40 = vld [vmem:[#allocation5 + $0xc8] sm:$0xff]  ;;  %1316 = vmatprep.subr.bf16.mxu1 %v2338_v0  ;;  %vm2915_vm13 = vmmov %vm2913_vm8 }
 0x2f3   : > { %1277 = vmatprep.subr.bf16.mxu0 %v1244_v40 }
 0x2f4   : > { %v1242_v54 = vld [vmem:[#allocation5 + $0xb8] sm:$0xff] }
 0x2f5   : > { %1317 = vmatpush1.bf16.msra.mxu1 %v1242_v54 }
 0x2f6   : > { %v1243_v56 = vld [vmem:[#allocation5 + $0xc0] sm:$0xff]  ;;  %1318 = vmatprep.subr.bf16.mxu1 %v2338_v0 }
 0x2f7   : > { %1278 = vmatpush1.bf16.msra.mxu0 %v1243_v56 }
 0x2f8   : > { %v1245_v59 = vld [vmem:[#allocation5 + $0xd0] sm:$0xff] }
 0x2f9   : > { %1319 = vmatpush1.bf16.msra.mxu1 %v1245_v59 }
 0x2fa   : > { %1294 = vmatmul.mubr.bf16.vlgmr.msra.gmra.mrb[4].mxu0 %v2241_v57  ;;  %1736 = vmatprep.subr.bf16.mxu1 %v2338_v0 }
 0x2fb   : > { %2285 = vmatprep.mubr.msk.bf16.mxu0 %vm751_vm0, %v2327_v30 }
 0x2fc   : > { %1335 = vmatmul.mubr.bf16.vlgmr.msra.gmra.mrb[4].mxu1 %v2241_v57 }
 0x2fd   : > { %2286 = vmatprep.mubr.msk.bf16.mxu1 %vm751_vm0, %v2327_v30 }
 0x2fe   : > { %v1250_v44 = vpop.permute.xlu1 %1249 }
 0x3cd   : > { %v1295_v60 = vpop.f32.mrb[4].mxu0 }
 0x3ce   : > { %v1296_v61 = vadd.f32 %v1295_v60, %v1250_v44  ;;  %v1297_v62 = vpop.f32.mrb[5].mxu0 }
 0x3cf   : > { %v1298_v63 = vadd.f32 %v1297_v62, %v1250_v44  ;;  %v1299_v1 = vpop.f32.mrb[6].mxu0  ;;  %v1336_v22 = vpop.f32.mrb[4].mxu1 }
 0x3d0   : > { %v1342_v2 = vmax.f32 %v1296_v61, 0.0  ;;  %v1337_v3 = vadd.f32 %v1336_v22, %v1250_v44  ;;  %v1300_v4 = vpop.f32.mrb[7].mxu0  ;;  %v1338_v5 = vpop.f32.mrb[5].mxu1 }
 0x3d1   : > { %v1343_v6 = vmax.f32 %v1298_v63, 0.0  ;;  %v1339_v7 = vpop.f32.mrb[6].mxu1 }
 0x3d2   : > { %v1345_v8 = vmul.f32 %v1342_v2, %v2554_v55  ;;  %v1344_v10 = vmax.f32 %v1337_v3, 0.0  ;;  %v1340_v11 = vpop.f32.mrb[7].mxu1 }
 0x3d3   : > { %v1346_v12 = vmul.f32 %v1343_v6, %v2556_v58 }
 0x3d4   : > { %v1347_v13 = vmul.f32 %v1344_v10, %v2552_v50 }
 0x3d5   : > { %v2293_v14 = vpack.c.bf16 %v1346_v12, %v1345_v8 }
 0x3d6   : > { %v2294_v15 = vpack.c.bf16 %v1347_v13, %v1347_v13 }
 0x3d7   : > { %1359 = vrot.lane.b32.xlu0 %v2293_v14, %s2349_s17 }
 0x3d8   : > { %1361 = vrot.lane.b32.xlu1 %v2294_v15, %s2349_s17 }
 0x449   : > { %v1360_v16 = vpop.permute.xlu0 %1359 }
 0x44a   : > { %v1363_v17 = vrot.slane %v1360_v16, 4  ;;  %v1362_v18 = vpop.permute.xlu1 %1361 }
 0x44b   : > { %v1364_v19 = vrot.slane %v1362_v18, 4 }
 0x44c   : > { %v1365_v20 = vsel %vm396_vm12, %v1363_v17, %v1360_v16 }
 0x44d   : > { %1374 = vst.msk [vmem:[#allocation3] sm:$0xff] %vm1373_vm10, %v1365_v20  ;;  %v1367_v21 = vsel %vm1366_vm14, %v1363_v17, %v1364_v19  ;;  %vm2916_vm14 = vcmask 449536  }
 0x44e   : > { %v1368_v23 = vsel %vm396_vm12, %v1367_v21, %v1362_v18  ;;  %vm2917_vm15 = vmmov %vm2916_vm14 }
 0x44f   : > { %1378 = vst.msk [vmem:[#allocation3 + $0x8] sm:$0xff] %vm1377_vm11, %v1368_v23  ;;  %vm2918_vm10 = vmmov %vm2916_vm14  ;;  %vm398_vm11 = vcmask 785792  }
 0x450   : > { %399 = vst.msk [vmem:[#allocation4 + $0x18] sm:$0xff] %vm398_vm11, %v2338_v0 }
 0x454   : > { %v1379_v24 = vld [vmem:[#allocation3] sm:$0xff] }
 0x455   : > { %v2248_v25 = vcombine.high %v1379_v24, %v1379_v24  ;;  %v2247_v28 = vcombine.low %v1379_v24, %v1379_v24 }
 0x456   : > { %v1380_v26 = vld [vmem:[#allocation3 + $0x8] sm:$0xff] }
 0x457   : > { %1393 = vrot.lane.b32.xlu0 %v2248_v25, %s2339_s20  ;;  %v2249_v27 = vcombine.low %v1380_v26, %v1380_v26  ;;  %v2250_v29 = vcombine.high %v1380_v26, %v1380_v26 }
 0x459   : > { %1395 = vrot.lane.b32.xlu1 %v2249_v27, %s2339_s20 }
 0x45b   : > { %1391 = vrot.lane.b32.xlu0 %v2247_v28, %s2339_s20 }
 0x45d   : > { %1397 = vrot.lane.b32.xlu1 %v2250_v29, %s2339_s20 }
 0x45f   : > { %1422 = vrot.lane.b32.xlu0 %v2248_v25, %s2340_s21 }
 0x461   : > { %1424 = vrot.lane.b32.xlu1 %v2249_v27, %s2340_s21 }
 0x463   : > { %1420 = vrot.lane.b32.xlu0 %v2247_v28, %s2340_s21 }
 0x465   : > { %1426 = vrot.lane.b32.xlu1 %v2250_v29, %s2340_s21 }
 0x467   : > { %1451 = vrot.lane.b32.xlu0 %v2248_v25, %s2341_s22 }
 0x469   : > { %1453 = vrot.lane.b32.xlu1 %v2249_v27, %s2341_s22 }
 0x46b   : > { %1449 = vrot.lane.b32.xlu0 %v2247_v28, %s2341_s22 }
 0x46d   : > { %1455 = vrot.lane.b32.xlu1 %v2250_v29, %s2341_s22 }
 0x46f   : > { %1480 = vrot.lane.b32.xlu0 %v2248_v25, %s2342_s23 }
 0x471   : > { %1482 = vrot.lane.b32.xlu1 %v2249_v27, %s2342_s23 }
 0x473   : > { %1478 = vrot.lane.b32.xlu0 %v2247_v28, %s2342_s23 }
 0x475   : > { %1484 = vrot.lane.b32.xlu1 %v2250_v29, %s2342_s23 }
 0x477   : > { %1509 = vrot.lane.b32.xlu0 %v2248_v25, %s2343_s24 }
 0x479   : > { %1511 = vrot.lane.b32.xlu1 %v2249_v27, %s2343_s24 }
 0x47b   : > { %1507 = vrot.lane.b32.xlu0 %v2247_v28, %s2343_s24 }
 0x47d   : > { %1513 = vrot.lane.b32.xlu1 %v2250_v29, %s2343_s24 }
 0x47f   : > { %1538 = vrot.lane.b32.xlu0 %v2248_v25, %s2344_s25 }
 0x481   : > { %1540 = vrot.lane.b32.xlu1 %v2249_v27, %s2344_s25 }
 0x483   : > { %1536 = vrot.lane.b32.xlu0 %v2247_v28, %s2344_s25 }
 0x485   : > { %1542 = vrot.lane.b32.xlu1 %v2250_v29, %s2344_s25 }
 0x487   : > { %1567 = vrot.lane.b32.xlu0 %v2248_v25, %s2345_s26 }
 0x489   : > { %1569 = vrot.lane.b32.xlu1 %v2249_v27, %s2345_s26 }
 0x48b   : > { %1565 = vrot.lane.b32.xlu0 %v2247_v28, %s2345_s26 }
 0x48d   : > { %1571 = vrot.lane.b32.xlu1 %v2250_v29, %s2345_s26 }
 0x48f   : > { %1596 = vrot.lane.b32.xlu0 %v2248_v25, %s2346_s27 }
 0x491   : > { %1598 = vrot.lane.b32.xlu1 %v2249_v27, %s2346_s27 }
 0x493   : > { %1594 = vrot.lane.b32.xlu0 %v2247_v28, %s2346_s27 }
 0x495   : > { %1600 = vrot.lane.b32.xlu1 %v2250_v29, %s2346_s27 }
 0x497   : > { %1625 = vrot.lane.b32.xlu0 %v2248_v25, %s2347_s30 }
 0x499   : > { %1627 = vrot.lane.b32.xlu1 %v2249_v27, %s2347_s30 }
 0x49b   : > { %1623 = vrot.lane.b32.xlu0 %v2247_v28, %s2347_s30 }
 0x49d   : > { %1629 = vrot.lane.b32.xlu1 %v2250_v29, %s2347_s30 }
 0x49f   : > { %1673 = vperm.xlu0 %2316, %v1669_v31  }
 0x4a1   : > { %1678 = vperm.xlu1 %2317, %v1670_v32  }
 0x4c9   : > { %v1394_v33 = vpop.permute.xlu0 %1393 }
 0x4cb   : > { %v1396_v34 = vpop.permute.xlu1 %1395 }
 0x4cc   : > { %v1400_v35 = vsel %vm425_vm1, %v1394_v33, %v1396_v34 }
 0x4cd   : > { %1406 = vst [vmem:[#allocation5 + $0x8] sm:$0xf] %v1400_v35  ;;  %v1392_v36 = vpop.permute.xlu0 %1391 }
 0x4ce   : > { %v1399_v37 = vsel %vm425_vm1, %v1392_v36, %v1394_v33 }
 0x4cf   : > { %1405 = vst [vmem:[#allocation5] sm:$0xf] %v1399_v37  ;;  %v1398_v41 = vpop.permute.xlu1 %1397 }
 0x4d0   : > { %v1401_v39 = vsel %vm425_vm1, %v1396_v34, %v1398_v41 }
 0x4d1   : > { %1407 = vst [vmem:[#allocation5 + $0x10] sm:$0xf] %v1401_v39  ;;  %v1423_v42 = vpop.permute.xlu0 %1422 }
 0x4d3   : > { %v1425_v43 = vpop.permute.xlu1 %1424 }
 0x4d4   : > { %v1429_v45 = vsel %vm459_vm2, %v1423_v42, %v1425_v43  ;;  %v1643_v9 = vld [vmem:[#allocation5 + $0x8] sm:$0xff] }
 0x4d5   : > { %1435 = vst [vmem:[#allocation5 + $0x20] sm:$0xf] %v1429_v45  ;;  %1693 = vmatprep.subr.bf16.mxu0 %v1643_v9  ;;  %v1421_v38 = vpop.permute.xlu0 %1420 }
 0x4d6   : > { %v1428_v46 = vsel %vm459_vm2, %v1421_v38, %v1423_v42  ;;  %v1642_v47 = vld [vmem:[#allocation5] sm:$0xff] }
 0x4d7   : > { %1434 = vst [vmem:[#allocation5 + $0x18] sm:$0xf] %v1428_v46  ;;  %v1427_v48 = vpop.permute.xlu1 %1426  ;;  %1694 = vmatpush1.bf16.msra.mxu0 %v1642_v47 }
 0x4d8   : > { %v1430_v49 = vsel %vm459_vm2, %v1425_v43, %v1427_v48  ;;  %v1644_v51 = vld [vmem:[#allocation5 + $0x10] sm:$0xff] }
 0x4d9   : > { %1436 = vst [vmem:[#allocation5 + $0x28] sm:$0xf] %v1430_v49  ;;  %1737 = vmatpush1.bf16.msra.mxu1 %v1644_v51  ;;  %v1452_v52 = vpop.permute.xlu0 %1451 }
 0x4da   : > { %1738 = vmatprep.subr.bf16.mxu1 %v2338_v0 }
 0x4db   : > { %v1454_v53 = vpop.permute.xlu1 %1453 }
 0x4dc   : > { %v1458_v40 = vsel %vm493_vm3, %v1452_v52, %v1454_v53  ;;  %v1646_v54 = vld [vmem:[#allocation5 + $0x20] sm:$0xff] }
 0x4dd   : > { %1464 = vst [vmem:[#allocation5 + $0x38] sm:$0xf] %v1458_v40  ;;  %1695 = vmatprep.subr.bf16.mxu0 %v1646_v54  ;;  %v1450_v56 = vpop.permute.xlu0 %1449 }
 0x4de   : > { %v1457_v57 = vsel %vm493_vm3, %v1450_v56, %v1452_v52  ;;  %v1645_v59 = vld [vmem:[#allocation5 + $0x18] sm:$0xff] }
 0x4df   : > { %1463 = vst [vmem:[#allocation5 + $0x30] sm:$0xf] %v1457_v57  ;;  %v1456_v44 = vpop.permute.xlu1 %1455  ;;  %1696 = vmatpush1.bf16.msra.mxu0 %v1645_v59 }
 0x4e0   : > { %v1459_v60 = vsel %vm493_vm3, %v1454_v53, %v1456_v44  ;;  %v1647_v61 = vld [vmem:[#allocation5 + $0x28] sm:$0xff] }
 0x4e1   : > { %1465 = vst [vmem:[#allocation5 + $0x40] sm:$0xf] %v1459_v60  ;;  %1739 = vmatpush1.bf16.msra.mxu1 %v1647_v61  ;;  %v1481_v62 = vpop.permute.xlu0 %1480 }
 0x4e2   : > { %1740 = vmatprep.subr.bf16.mxu1 %v2338_v0 }
 0x4e3   : > { %v1483_v63 = vpop.permute.xlu1 %1482 }
 0x4e4   : > { %v1487_v1 = vsel %vm527_vm4, %v1481_v62, %v1483_v63  ;;  %v1649_v22 = vld [vmem:[#allocation5 + $0x38] sm:$0xff] }
 0x4e5   : > { %1493 = vst [vmem:[#allocation5 + $0x50] sm:$0xf] %v1487_v1  ;;  %1697 = vmatprep.subr.bf16.mxu0 %v1649_v22  ;;  %v1479_v2 = vpop.permute.xlu0 %1478  ;;  %v2329_v1 = vld [vmem:[%s2899_s6] ss:$8 sps:$4 sm:$0xff]  }
 0x4e6   : > { %v1486_v3 = vsel %vm527_vm4, %v1479_v2, %v1481_v62  ;;  %v1648_v4 = vld [vmem:[#allocation5 + $0x30] sm:$0xff] }
 0x4e7   : > { %1492 = vst [vmem:[#allocation5 + $0x48] sm:$0xf] %v1486_v3  ;;  %v1485_v5 = vpop.permute.xlu1 %1484  ;;  %1698 = vmatpush1.bf16.msra.mxu0 %v1648_v4 }
 0x4e8   : > { %v1488_v6 = vsel %vm527_vm4, %v1483_v63, %v1485_v5  ;;  %v1650_v7 = vld [vmem:[#allocation5 + $0x40] sm:$0xff] }
 0x4e9   : > { %1494 = vst [vmem:[#allocation5 + $0x58] sm:$0xf] %v1488_v6  ;;  %1741 = vmatpush1.bf16.msra.mxu1 %v1650_v7  ;;  %v1510_v8 = vpop.permute.xlu0 %1509 }
 0x4ea   : > { %1742 = vmatprep.subr.bf16.mxu1 %v2338_v0 }
 0x4eb   : > { %v1512_v10 = vpop.permute.xlu1 %1511 }
 0x4ec   : > { %v1516_v11 = vsel %vm561_vm5, %v1510_v8, %v1512_v10  ;;  %v1652_v12 = vld [vmem:[#allocation5 + $0x50] sm:$0xff] }
 0x4ed   : > { %1522 = vst [vmem:[#allocation5 + $0x68] sm:$0xf] %v1516_v11  ;;  %1699 = vmatprep.subr.bf16.mxu0 %v1652_v12  ;;  %v1508_v13 = vpop.permute.xlu0 %1507 }
 0x4ee   : > { %v1515_v14 = vsel %vm561_vm5, %v1508_v13, %v1510_v8  ;;  %v1651_v15 = vld [vmem:[#allocation5 + $0x48] sm:$0xff] }
 0x4ef   : > { %1521 = vst [vmem:[#allocation5 + $0x60] sm:$0xf] %v1515_v14  ;;  %v1514_v16 = vpop.permute.xlu1 %1513  ;;  %1700 = vmatpush1.bf16.msra.mxu0 %v1651_v15 }
 0x4f0   : > { %v1517_v17 = vsel %vm561_vm5, %v1512_v10, %v1514_v16  ;;  %v1653_v18 = vld [vmem:[#allocation5 + $0x58] sm:$0xff] }
 0x4f1   : > { %1523 = vst [vmem:[#allocation5 + $0x70] sm:$0xf] %v1517_v17  ;;  %1743 = vmatpush1.bf16.msra.mxu1 %v1653_v18  ;;  %v1539_v19 = vpop.permute.xlu0 %1538 }
 0x4f2   : > { %1744 = vmatprep.subr.bf16.mxu1 %v2338_v0 }
 0x4f3   : > { %v1541_v20 = vpop.permute.xlu1 %1540 }
 0x4f4   : > { %v1545_v21 = vsel %vm595_vm6, %v1539_v19, %v1541_v20  ;;  %v1655_v23 = vld [vmem:[#allocation5 + $0x68] sm:$0xff] }
 0x4f5   : > { %1551 = vst [vmem:[#allocation5 + $0x80] sm:$0xf] %v1545_v21  ;;  %1701 = vmatprep.subr.bf16.mxu0 %v1655_v23  ;;  %v1537_v24 = vpop.permute.xlu0 %1536 }
 0x4f6   : > { %v1544_v25 = vsel %vm595_vm6, %v1537_v24, %v1539_v19  ;;  %v1654_v26 = vld [vmem:[#allocation5 + $0x60] sm:$0xff] }
 0x4f7   : > { %1550 = vst [vmem:[#allocation5 + $0x78] sm:$0xf] %v1544_v25  ;;  %v1543_v27 = vpop.permute.xlu1 %1542  ;;  %1702 = vmatpush1.bf16.msra.mxu0 %v1654_v26 }
 0x4f8   : > { %v1546_v28 = vsel %vm595_vm6, %v1541_v20, %v1543_v27  ;;  %v1656_v29 = vld [vmem:[#allocation5 + $0x70] sm:$0xff] }
 0x4f9   : > { %1552 = vst [vmem:[#allocation5 + $0x88] sm:$0xf] %v1546_v28  ;;  %1745 = vmatpush1.bf16.msra.mxu1 %v1656_v29  ;;  %v1568_v30 = vpop.permute.xlu0 %1567 }
 0x4fa   : > { %1746 = vmatprep.subr.bf16.mxu1 %v2338_v0 }
 0x4fb   : > { %v1570_v31 = vpop.permute.xlu1 %1569 }
 0x4fc   : > { %v1574_v32 = vsel %vm629_vm7, %v1568_v30, %v1570_v31  ;;  %v1658_v33 = vld [vmem:[#allocation5 + $0x80] sm:$0xff] }
 0x4fd   : > { %1580 = vst [vmem:[#allocation5 + $0x98] sm:$0xf] %v1574_v32  ;;  %1703 = vmatprep.subr.bf16.mxu0 %v1658_v33  ;;  %v1566_v34 = vpop.permute.xlu0 %1565 }
 0x4fe   : > { %v1573_v35 = vsel %vm629_vm7, %v1566_v34, %v1568_v30  ;;  %v1657_v36 = vld [vmem:[#allocation5 + $0x78] sm:$0xff] }
 0x4ff   : > { %1579 = vst [vmem:[#allocation5 + $0x90] sm:$0xf] %v1573_v35  ;;  %v1572_v37 = vpop.permute.xlu1 %1571  ;;  %1704 = vmatpush1.bf16.msra.mxu0 %v1657_v36 }
 0x500   : > { %v1575_v41 = vsel %vm629_vm7, %v1570_v31, %v1572_v37  ;;  %v1659_v39 = vld [vmem:[#allocation5 + $0x88] sm:$0xff] }
 0x501   : > { %1581 = vst [vmem:[#allocation5 + $0xa0] sm:$0xf] %v1575_v41  ;;  %1747 = vmatpush1.bf16.msra.mxu1 %v1659_v39  ;;  %v1597_v42 = vpop.permute.xlu0 %1596  ;;  %v2818_v39 = vld.sshfl [vmem:[%s2901_s8] sm:$0x33 pattern:$0x76325410] }
 0x502   : > { %1748 = vmatprep.subr.bf16.mxu1 %v2338_v0 }
 0x503   : > { %v1599_v43 = vpop.permute.xlu1 %1598 }
 0x504   : > { %v1603_v45 = vsel %vm2913_vm8, %v1597_v42, %v1599_v43  ;;  %v1661_v9 = vld [vmem:[#allocation5 + $0x98] sm:$0xff]  ;;  %vm1807_vm8 = vcmask 1047936  }
 0x505   : > { %1609 = vst [vmem:[#allocation5 + $0xb0] sm:$0xf] %v1603_v45  ;;  %1705 = vmatprep.subr.bf16.mxu0 %v1661_v9  ;;  %v1595_v38 = vpop.permute.xlu0 %1594 }
 0x506   : > { %v1602_v46 = vsel %vm2914_vm9, %v1595_v38, %v1597_v42  ;;  %v1660_v47 = vld [vmem:[#allocation5 + $0x90] sm:$0xff]  ;;  %v2079_v42 = vcombine.high %v2818_v39, %v2818_v39 }
 0x507   : > { %1608 = vst [vmem:[#allocation5 + $0xa8] sm:$0xf] %v1602_v46  ;;  %v1601_v48 = vpop.permute.xlu1 %1600  ;;  %1706 = vmatpush1.bf16.msra.mxu0 %v1660_v47 }
 0x508   : > { %v1604_v49 = vsel %vm2915_vm13, %v1599_v43, %v1601_v48  ;;  %v1662_v51 = vld [vmem:[#allocation5 + $0xa0] sm:$0xff]  ;;  %v2065_v43 = vld [vmem:[%s2902_s9] sm:$0xf] }
 0x509   : > { %1610 = vst [vmem:[#allocation5 + $0xb8] sm:$0xf] %v1604_v49  ;;  %1749 = vmatpush1.bf16.msra.mxu1 %v1662_v51  ;;  %v1626_v52 = vpop.permute.xlu0 %1625 }
 0x50a   : > { %1750 = vmatprep.subr.bf16.mxu1 %v2338_v0 }
 0x50b   : > { %v1628_v53 = vpop.permute.xlu1 %1627 }
 0x50c   : > { %v1632_v40 = vsel %vm2916_vm14, %v1626_v52, %v1628_v53  ;;  %v1664_v54 = vld [vmem:[#allocation5 + $0xb0] sm:$0xff] }
 0x50d   : > { %1638 = vst [vmem:[#allocation5 + $0xc8] sm:$0xf] %v1632_v40  ;;  %1707 = vmatprep.subr.bf16.mxu0 %v1664_v54  ;;  %v1624_v56 = vpop.permute.xlu0 %1623 }
 0x50e   : > { %v1631_v57 = vsel %vm2917_vm15, %v1624_v56, %v1626_v52  ;;  %v1663_v59 = vld [vmem:[#allocation5 + $0xa8] sm:$0xff] }
 0x50f   : > { %1637 = vst [vmem:[#allocation5 + $0xc0] sm:$0xf] %v1631_v57  ;;  %v1630_v44 = vpop.permute.xlu1 %1629  ;;  %1708 = vmatpush1.bf16.msra.mxu0 %v1663_v59 }
 0x510   : > { %v1633_v60 = vsel %vm2918_vm10, %v1628_v53, %v1630_v44  ;;  %v1665_v61 = vld [vmem:[#allocation5 + $0xb8] sm:$0xff] }
 0x511   : > { %1639 = vst [vmem:[#allocation5 + $0xd0] sm:$0xf] %v1633_v60  ;;  %1751 = vmatpush1.bf16.msra.mxu1 %v1665_v61 }
 0x512   : > { %1752 = vmatprep.subr.bf16.mxu1 %v2338_v0 }
 0x514   : > { %v1667_v62 = vld [vmem:[#allocation5 + $0xc8] sm:$0xff] }
 0x515   : > { %1709 = vmatprep.subr.bf16.mxu0 %v1667_v62 }
 0x516   : > { %v1666_v63 = vld [vmem:[#allocation5 + $0xc0] sm:$0xff] }
 0x517   : > { %1710 = vmatpush1.bf16.msra.mxu0 %v1666_v63 }
 0x518   : > { %v1668_v22 = vld [vmem:[#allocation5 + $0xd0] sm:$0xff] }
 0x519   : > { %1753 = vmatpush1.bf16.msra.mxu1 %v1668_v22 }
 0x51a   : > { %1726 = vmatmul.mubr.bf16.vlgmr.msra.gmra.mrb[8].mxu0 %v2329_v1  ;;  %2125 = vmatprep.subr.bf16.mxu1 %v2338_v0 }
 0x51b   : > { %2288 = vmatprep.mubr.msk.bf16.mxu0 %vm751_vm0, %v2079_v42 }
 0x51c   : > { %1769 = vmatmul.mubr.bf16.vlgmr.msra.gmra.mrb[8].mxu1 %v2329_v1 }
 0x51d   : > { %2289 = vmatprep.mubr.msk.bf16.mxu1 %vm751_vm0, %v2079_v42  ;;  %vm2919_vm0 = vmmov %vm2914_vm9 }
 0x51e   : > { %v1674_v2 = vpop.permute.xlu0 %1673 }
 0x520   : > { %v1679_v4 = vpop.permute.xlu1 %1678 }
 0x5ed   : > { %v1727_v3 = vpop.f32.mrb[8].mxu0 }
 0x5ee   : > { %v1728_v5 = vadd.f32 %v1727_v3, %v1674_v2  ;;  %v1729_v6 = vpop.f32.mrb[9].mxu0 }
 0x5ef   : > { %v1730_v7 = vadd.f32 %v1729_v6, %v1674_v2  ;;  %v1731_v8 = vpop.f32.mrb[10].mxu0  ;;  %v1770_v10 = vpop.f32.mrb[8].mxu1 }
 0x5f0   : > { %v1777_v11 = vmax.f32 %v1728_v5, 0.0  ;;  %v1732_v12 = vadd.f32 %v1731_v8, %v1679_v4  ;;  %v1771_v13 = vadd.f32 %v1770_v10, %v1674_v2  ;;  %v1733_v14 = vpop.f32.mrb[11].mxu0  ;;  %v1772_v15 = vpop.f32.mrb[9].mxu1 }
 0x5f1   : > { %v1778_v16 = vmax.f32 %v1730_v7, 0.0  ;;  %v1734_v17 = vadd.f32 %v1733_v14, %v1679_v4  ;;  %v1773_v18 = vpop.f32.mrb[10].mxu1 }
 0x5f2   : > { %v1780_v19 = vmax.f32 %v1732_v12, 0.0  ;;  %v1779_v20 = vmax.f32 %v1771_v13, 0.0  ;;  %v1774_v21 = vadd.f32 %v1773_v18, %v1679_v4  ;;  %v1775_v23 = vpop.f32.mrb[11].mxu1  ;;  %v1783_v25 = vmul.f32 %v1777_v11, %v2554_v55 }
 0x5f3   : > { %v1781_v24 = vmax.f32 %v1734_v17, 0.0  ;;  %v1784_v28 = vmul.f32 %v1778_v16, %v2556_v58 }
 0x5f4   : > { %v1786_v26 = vmul.f32 %v1780_v19, %v2554_v55  ;;  %v1782_v27 = vmax.f32 %v1774_v21, 0.0  ;;  %v1785_v31 = vmul.f32 %v1779_v20, %v2552_v50 }
 0x5f5   : > { %v1787_v29 = vmul.f32 %v1781_v24, %v2556_v58 }
 0x5f6   : > { %v1789_v30 = vpack.c.bf16 %v1786_v26, %v1783_v25  ;;  %v1788_v32 = vmul.f32 %v1782_v27, %v2552_v50 }
 0x5f7   : > { %v1790_v33 = vpack.c.bf16 %v1787_v29, %v1784_v28 }
 0x5f8   : > { %v1791_v34 = vpack.c.bf16 %v1788_v32, %v1785_v31  ;;  %1795 = vrot.lane.b32.xlu0 %v1789_v30, %s2349_s17 }
 0x5f9   : > { %1797 = vrot.lane.b32.xlu1 %v1790_v33, %s2349_s17 }
 0x5fc   : > { %1799 = vrot.lane.b32.xlu0 %v1791_v34, %s2349_s17 }
 0x66a   : > { %v1796_v55 = vpop.permute.xlu0 %1795 }
 0x66b   : > { %1808 = vst.msk [vmem:[#allocation4] sm:$0xff] %vm1807_vm8, %v1796_v55  ;;  %v1798_v35 = vpop.permute.xlu1 %1797 }
 0x66c   : > { %v1801_v36 = vsel %vm396_vm12, %v1796_v55, %v1798_v35 }
 0x66e   : > { %v1800_v58 = vpop.permute.xlu0 %1799 }
 0x66f   : > { %v1802_v37 = vsel %vm396_vm12, %v1798_v35, %v1800_v58  ;;  %1811 = vst.msk [vmem:[#allocation4 + $0x18] sm:$0xff] %vm396_vm12, %v1800_v58 }
 0x672   : > { %v1812_v50 = vld [vmem:[#allocation4] sm:$0xff] }
 0x673   : > { %1820 = vrot.lane.b32.xlu1 %v1812_v50, %s2339_s20 }
 0x676   : > { %v1815_v41 = vld [vmem:[#allocation4 + $0x18] sm:$0xff] }
 0x677   : > { %1845 = vrot.lane.b32.xlu1 %v1812_v50, %s2340_s21  ;;  %1826 = vrot.lane.b32.xlu0 %v1815_v41, %s2339_s20 }
 0x67b   : > { %1870 = vrot.lane.b32.xlu1 %v1812_v50, %s2341_s22  ;;  %1851 = vrot.lane.b32.xlu0 %v1815_v41, %s2340_s21 }
 0x67f   : > { %1895 = vrot.lane.b32.xlu1 %v1812_v50, %s2342_s23  ;;  %1876 = vrot.lane.b32.xlu0 %v1815_v41, %s2341_s22 }
 0x683   : > { %1920 = vrot.lane.b32.xlu1 %v1812_v50, %s2343_s24  ;;  %1901 = vrot.lane.b32.xlu0 %v1815_v41, %s2342_s23 }
 0x687   : > { %1945 = vrot.lane.b32.xlu1 %v1812_v50, %s2344_s25  ;;  %1926 = vrot.lane.b32.xlu0 %v1815_v41, %s2343_s24 }
 0x68b   : > { %1970 = vrot.lane.b32.xlu1 %v1812_v50, %s2345_s26  ;;  %1951 = vrot.lane.b32.xlu0 %v1815_v41, %s2344_s25 }
 0x68f   : > { %1995 = vrot.lane.b32.xlu1 %v1812_v50, %s2346_s27  ;;  %1976 = vrot.lane.b32.xlu0 %v1815_v41, %s2345_s26 }
 0x693   : > { %1822 = vrot.lane.b32.xlu1 %v1801_v36, %s2339_s20  ;;  %2001 = vrot.lane.b32.xlu0 %v1815_v41, %s2346_s27 }
 0x697   : > { %1847 = vrot.lane.b32.xlu1 %v1801_v36, %s2340_s21  ;;  %1824 = vrot.lane.b32.xlu0 %v1802_v37, %s2339_s20 }
 0x69b   : > { %1872 = vrot.lane.b32.xlu1 %v1801_v36, %s2341_s22  ;;  %1849 = vrot.lane.b32.xlu0 %v1802_v37, %s2340_s21 }
 0x69f   : > { %1897 = vrot.lane.b32.xlu1 %v1801_v36, %s2342_s23  ;;  %1874 = vrot.lane.b32.xlu0 %v1802_v37, %s2341_s22 }
 0x6a3   : > { %1922 = vrot.lane.b32.xlu1 %v1801_v36, %s2343_s24  ;;  %1899 = vrot.lane.b32.xlu0 %v1802_v37, %s2342_s23  ;;  %s2295_s23 = smul.u32 12, %s2926_s14 }
 0x6a7   : > { %1947 = vrot.lane.b32.xlu1 %v1801_v36, %s2344_s25  ;;  %1924 = vrot.lane.b32.xlu0 %v1802_v37, %s2343_s24 }
 0x6ab   : > { %1972 = vrot.lane.b32.xlu1 %v1801_v36, %s2345_s26  ;;  %1949 = vrot.lane.b32.xlu0 %v1802_v37, %s2344_s25 }
 0x6af   : > { %1997 = vrot.lane.b32.xlu1 %v1801_v36, %s2346_s27  ;;  %1974 = vrot.lane.b32.xlu0 %v1802_v37, %s2345_s26  ;;  %s359_s26 = scalar_lea.vmem %s2903_s10, %s2295_s23 }
 0x6b3   : > { %2022 = vrot.lane.b32.xlu1 %v1801_v36, %s2347_s30  ;;  %1999 = vrot.lane.b32.xlu0 %v1802_v37, %s2346_s27 }
 0x6b7   : > { %2020 = vrot.lane.b32.xlu1 %v1812_v50, %s2347_s30  ;;  %2024 = vrot.lane.b32.xlu0 %v1802_v37, %s2347_s30 }
 0x6bb   : > { %2068 = vperm.xlu1 %2317, %v2065_v43   ;;  %2026 = vrot.lane.b32.xlu0 %v1815_v41, %s2347_s30 }
 0x6e5   : > { %v1821_v45 = vpop.permute.xlu1 %1820 }
 0x6e9   : > { %v1846_v9 = vpop.permute.xlu1 %1845  ;;  %v1827_v38 = vpop.permute.xlu0 %1826 }
 0x6ed   : > { %v1871_v46 = vpop.permute.xlu1 %1870  ;;  %v1852_v47 = vpop.permute.xlu0 %1851 }
 0x6f1   : > { %v1896_v48 = vpop.permute.xlu1 %1895  ;;  %v1877_v49 = vpop.permute.xlu0 %1876 }
 0x6f5   : > { %v1921_v51 = vpop.permute.xlu1 %1920  ;;  %v1902_v52 = vpop.permute.xlu0 %1901 }
 0x6f9   : > { %v1946_v53 = vpop.permute.xlu1 %1945  ;;  %v1927_v40 = vpop.permute.xlu0 %1926 }
 0x6fd   : > { %v2834_v54 = vpop.permute.xlu1 %1970  ;;  %v2836_v56 = vpop.permute.xlu0 %1951 }
 0x701   : > { %v2838_v57 = vpop.permute.xlu1 %1995  ;;  %v2840_v59 = vpop.permute.xlu0 %1976 }
 0x705   : > { %v1823_v44 = vpop.permute.xlu1 %1822  ;;  %v2842_v60 = vpop.permute.xlu0 %2001 }
 0x706   : > { %v1828_v61 = vsel %vm425_vm1, %v1821_v45, %v1823_v44 }
 0x707   : > { %1834 = vst [vmem:[#allocation5] sm:$0xff] %v1828_v61 }
 0x709   : > { %v1848_v62 = vpop.permute.xlu1 %1847  ;;  %v1825_v63 = vpop.permute.xlu0 %1824 }
 0x70a   : > { %v1853_v1 = vsel %vm459_vm2, %v1846_v9, %v1848_v62  ;;  %v1829_v22 = vsel %vm425_vm1, %v1823_v44, %v1825_v63  ;;  %v1830_v2 = vsel %vm425_vm1, %v1825_v63, %v1827_v38  ;;  %vm2920_vm1 = vmmov %vm2919_vm0 }
 0x70b   : > { %1859 = vst [vmem:[#allocation5 + $0x18] sm:$0xff] %v1853_v1  ;;  %1835 = vst [vmem:[#allocation5 + $0x8] sm:$0xff] %v1829_v22  ;;  %2084 = vmatprep.subr.bf16.mxu0 %v1829_v22  ;;  %2126 = vmatpush1.bf16.msra.mxu1 %v1830_v2 }
 0x70c   : > { %1836 = vst [vmem:[#allocation5 + $0x10] sm:$0xff] %v1830_v2  ;;  %2085 = vmatpush1.bf16.msra.mxu0 %v1828_v61  ;;  %2127 = vmatprep.subr.bf16.mxu1 %v2338_v0 }
 0x70d   : > { %v1873_v3 = vpop.permute.xlu1 %1872  ;;  %v1850_v4 = vpop.permute.xlu0 %1849 }
 0x70e   : > { %v1878_v5 = vsel %vm493_vm3, %v1871_v46, %v1873_v3  ;;  %v1854_v6 = vsel %vm459_vm2, %v1848_v62, %v1850_v4  ;;  %v1855_v7 = vsel %vm459_vm2, %v1850_v4, %v1852_v47  ;;  %vm2921_vm2 = vmmov %vm2919_vm0 }
 0x70f   : > { %1884 = vst [vmem:[#allocation5 + $0x30] sm:$0xff] %v1878_v5  ;;  %1860 = vst [vmem:[#allocation5 + $0x20] sm:$0xff] %v1854_v6  ;;  %2086 = vmatprep.subr.bf16.mxu0 %v1854_v6  ;;  %2128 = vmatpush1.bf16.msra.mxu1 %v1855_v7 }
 0x710   : > { %1861 = vst [vmem:[#allocation5 + $0x28] sm:$0xff] %v1855_v7  ;;  %2087 = vmatpush1.bf16.msra.mxu0 %v1853_v1  ;;  %2129 = vmatprep.subr.bf16.mxu1 %v2338_v0 }
 0x711   : > { %v1898_v8 = vpop.permute.xlu1 %1897  ;;  %v1875_v10 = vpop.permute.xlu0 %1874 }
 0x712   : > { %v1903_v11 = vsel %vm527_vm4, %v1896_v48, %v1898_v8  ;;  %v1879_v12 = vsel %vm493_vm3, %v1873_v3, %v1875_v10  ;;  %v1880_v13 = vsel %vm493_vm3, %v1875_v10, %v1877_v49  ;;  %vm2922_vm3 = vmmov %vm2918_vm10 }
 0x713   : > { %1909 = vst [vmem:[#allocation5 + $0x48] sm:$0xff] %v1903_v11  ;;  %1885 = vst [vmem:[#allocation5 + $0x38] sm:$0xff] %v1879_v12  ;;  %2088 = vmatprep.subr.bf16.mxu0 %v1879_v12  ;;  %2130 = vmatpush1.bf16.msra.mxu1 %v1880_v13 }
 0x714   : > { %1886 = vst [vmem:[#allocation5 + $0x40] sm:$0xff] %v1880_v13  ;;  %2089 = vmatpush1.bf16.msra.mxu0 %v1878_v5  ;;  %2131 = vmatprep.subr.bf16.mxu1 %v2338_v0 }
 0x715   : > { %v1923_v14 = vpop.permute.xlu1 %1922  ;;  %v1900_v15 = vpop.permute.xlu0 %1899 }
 0x716   : > { %v1928_v16 = vsel %vm561_vm5, %v1921_v51, %v1923_v14  ;;  %v1904_v17 = vsel %vm527_vm4, %v1898_v8, %v1900_v15  ;;  %v1905_v18 = vsel %vm527_vm4, %v1900_v15, %v1902_v52  ;;  %vm2923_vm4 = vmmov %vm2922_vm3 }
 0x717   : > { %1934 = vst [vmem:[#allocation5 + $0x60] sm:$0xff] %v1928_v16  ;;  %1910 = vst [vmem:[#allocation5 + $0x50] sm:$0xff] %v1904_v17  ;;  %2090 = vmatprep.subr.bf16.mxu0 %v1904_v17  ;;  %2132 = vmatpush1.bf16.msra.mxu1 %v1905_v18 }
 0x718   : > { %1911 = vst [vmem:[#allocation5 + $0x58] sm:$0xff] %v1905_v18  ;;  %2091 = vmatpush1.bf16.msra.mxu0 %v1903_v11  ;;  %2133 = vmatprep.subr.bf16.mxu1 %v2338_v0 }
 0x719   : > { %v1948_v19 = vpop.permute.xlu1 %1947  ;;  %v1925_v20 = vpop.permute.xlu0 %1924 }
 0x71a   : > { %v1953_v21 = vsel %vm595_vm6, %v1946_v53, %v1948_v19  ;;  %v1929_v23 = vsel %vm561_vm5, %v1923_v14, %v1925_v20  ;;  %v1930_v24 = vsel %vm561_vm5, %v1925_v20, %v1927_v40  ;;  %vm2924_vm5 = vmmov %vm2922_vm3 }
 0x71b   : > { %1959 = vst [vmem:[#allocation5 + $0x78] sm:$0xff] %v1953_v21  ;;  %1935 = vst [vmem:[#allocation5 + $0x68] sm:$0xff] %v1929_v23  ;;  %2092 = vmatprep.subr.bf16.mxu0 %v1929_v23  ;;  %2134 = vmatpush1.bf16.msra.mxu1 %v1930_v24 }
 0x71c   : > { %1936 = vst [vmem:[#allocation5 + $0x70] sm:$0xff] %v1930_v24  ;;  %2093 = vmatpush1.bf16.msra.mxu0 %v1928_v16  ;;  %2135 = vmatprep.subr.bf16.mxu1 %v2338_v0 }
 0x71d   : > { %v1973_v25 = vpop.permute.xlu1 %1972  ;;  %v1950_v26 = vpop.permute.xlu0 %1949 }
 0x71e   : > { %v1978_v27 = vsel %vm629_vm7, %v2834_v54, %v1973_v25  ;;  %v1954_v28 = vsel %vm595_vm6, %v1948_v19, %v1950_v26  ;;  %v1955_v29 = vsel %vm595_vm6, %v1950_v26, %v2836_v56 }
 0x71f   : > { %1984 = vst [vmem:[#allocation5 + $0x90] sm:$0xff] %v1978_v27  ;;  %1960 = vst [vmem:[#allocation5 + $0x80] sm:$0xff] %v1954_v28  ;;  %2094 = vmatprep.subr.bf16.mxu0 %v1954_v28  ;;  %2136 = vmatpush1.bf16.msra.mxu1 %v1955_v29 }
 0x720   : > { %1961 = vst [vmem:[#allocation5 + $0x88] sm:$0xff] %v1955_v29  ;;  %2095 = vmatpush1.bf16.msra.mxu0 %v1953_v21  ;;  %2137 = vmatprep.subr.bf16.mxu1 %v2338_v0 }
 0x721   : > { %v1998_v30 = vpop.permute.xlu1 %1997  ;;  %v1975_v31 = vpop.permute.xlu0 %1974 }
 0x722   : > { %v2003_v32 = vsel %vm2919_vm0, %v2838_v57, %v1998_v30  ;;  %v1979_v33 = vsel %vm629_vm7, %v1973_v25, %v1975_v31  ;;  %v1980_v34 = vsel %vm629_vm7, %v1975_v31, %v2840_v59 }
 0x723   : > { %2009 = vst [vmem:[#allocation5 + $0xa8] sm:$0xff] %v2003_v32  ;;  %1985 = vst [vmem:[#allocation5 + $0x98] sm:$0xff] %v1979_v33  ;;  %2096 = vmatprep.subr.bf16.mxu0 %v1979_v33  ;;  %2138 = vmatpush1.bf16.msra.mxu1 %v1980_v34 }
 0x724   : > { %1986 = vst [vmem:[#allocation5 + $0xa0] sm:$0xff] %v1980_v34  ;;  %2097 = vmatpush1.bf16.msra.mxu0 %v1978_v27  ;;  %2139 = vmatprep.subr.bf16.mxu1 %v2338_v0 }
 0x725   : > { %v2023_v55 = vpop.permute.xlu1 %2022  ;;  %v2000_v35 = vpop.permute.xlu0 %1999 }
 0x726   : > { %v2004_v36 = vsel %vm2920_vm1, %v1998_v30, %v2000_v35  ;;  %v2005_v58 = vsel %vm2921_vm2, %v2000_v35, %v2842_v60 }
 0x727   : > { %2010 = vst [vmem:[#allocation5 + $0xb0] sm:$0xff] %v2004_v36  ;;  %2011 = vst [vmem:[#allocation5 + $0xb8] sm:$0xff] %v2005_v58  ;;  %2098 = vmatprep.subr.bf16.mxu0 %v2004_v36  ;;  %2140 = vmatpush1.bf16.msra.mxu1 %v2005_v58 }
 0x728   : > { %2099 = vmatpush1.bf16.msra.mxu0 %v2003_v32  ;;  %2141 = vmatprep.subr.bf16.mxu1 %v2338_v0 }
 0x729   : > { %v2021_v37 = vpop.permute.xlu1 %2020  ;;  %v2025_v50 = vpop.permute.xlu0 %2024 }
 0x72a   : > { %v2028_v41 = vsel %vm2922_vm3, %v2021_v37, %v2023_v55  ;;  %v2029_v42 = vsel %vm2923_vm4, %v2023_v55, %v2025_v50 }
 0x72b   : > { %2034 = vst [vmem:[#allocation5 + $0xc0] sm:$0xff] %v2028_v41  ;;  %2035 = vst [vmem:[#allocation5 + $0xc8] sm:$0xff] %v2029_v42  ;;  %2100 = vmatprep.subr.bf16.mxu0 %v2029_v42 }
 0x72c   : > { %2101 = vmatpush1.bf16.msra.mxu0 %v2028_v41 }
 0x72d   : > { %v2027_v43 = vpop.permute.xlu0 %2026 }
 0x72e   : > { %v2030_v45 = vsel %vm2924_vm5, %v2025_v50, %v2027_v43 }
 0x72f   : > { %2036 = vst [vmem:[#allocation5 + $0xd0] sm:$0xff] %v2030_v45  ;;  %2117 = vmatmul.mubr.bf16.vlgmr.msra.gmra.mrb[12].mxu0 %v2818_v39  ;;  %2142 = vmatpush1.bf16.msra.mxu1 %v2030_v45 }
 0x732   : > { %2158 = vmatmul.mubr.bf16.vlgmr.msra.gmra.mrb[12].mxu1 %v2818_v39 }
 0x73a   : > { %v2069_v0 = vpop.permute.xlu1 %2068 }
 0x802   : > { %v2118_v9 = vpop.f32.mrb[12].mxu0 }
 0x803   : > { %v2119_v38 = vadd.f32 %v2118_v9, %v2069_v0  ;;  %v2120_v46 = vpop.f32.mrb[13].mxu0 }
 0x804   : > { %v2121_v47 = vadd.f32 %v2120_v46, %v2069_v0  ;;  %v2122_v48 = vpop.f32.mrb[14].mxu0 }
 0x805   : > { %v2165_v49 = vmax.f32 %v2119_v38, 0.0  ;;  %v2123_v51 = vpop.f32.mrb[15].mxu0  ;;  %v2159_v52 = vpop.f32.mrb[12].mxu1 }
 0x806   : > { %v2166_v53 = vmax.f32 %v2121_v47, 0.0  ;;  %v2160_v40 = vadd.f32 %v2159_v52, %v2069_v0  ;;  %v2161_v54 = vpop.f32.mrb[13].mxu1 }
 0x807   : > { %v2162_v56 = vpop.f32.mrb[14].mxu1 }
 0x808   : > { %v2170_v57 = vcombine.low %v2165_v49, %v2166_v53  ;;  %v2167_v39 = vmax.f32 %v2160_v40, 0.0  ;;  %v2163_v59 = vpop.f32.mrb[15].mxu1 }
 0x80a   : > { %2172 = vst [vmem:[%s359_s26] sm:$0xff] %v2170_v57  ;;  %2173 = vst [vmem:[%s359_s26 + $0x8] sm:$0xf] %v2167_v39 }
 0x80b PF: > { %s20_s13 = sadd.s32 1, %s2336_s13  }
 0x80c   : > { %p17_p4 = scmp.ge.s32.totalorder %s20_s13, 4  }
 0x80e   :  { %19 = sbr.rel (!%p17_p4) target bundleno = 1 (0x1), region = 90 }

</bundles_post_ra>
